<compile_context>
chip_gen: v5e
topology: v5e:2x2
jax: 0.10.0
libtpu: 0.0.40
codegen_flags: <defaults>
</compile_context>

<pallas_src>
import functools

import jax
import jax.numpy as jnp
from jax.experimental import pallas as pl
from jax.experimental.pallas import tpu as pltpu


def _layernorm(x, gamma, beta, eps=1e-5):
    # PyTorch nn.LayerNorm: biased variance over the last dim, eps inside sqrt.
    mu = jnp.mean(x, axis=-1, keepdims=True)
    var = jnp.mean((x - mu) ** 2, axis=-1, keepdims=True)
    return (x - mu) * jax.lax.rsqrt(var + eps) * gamma + beta


def block_kernel(x_ref,
                 ln1_g_ref, ln1_b_ref,
                 wqkv_ref, wo_ref, bo_ref,
                 ln2_g_ref, ln2_b_ref,
                 w1_ref, b1_ref, w2_ref, b2_ref,
                 out_ref,
                 *, n_heads, head_dim):
    Bt, T, C = x_ref.shape
    H, Dh = n_heads, head_dim
    hd = H * Dh
    M = Bt * T               # matmul M-dim for projections / FFN
    G = Bt * H               # attention batch (batch-in-tile x heads)
    mxu_dtype = wqkv_ref.dtype   # bf16 weights -> bf16 MXU operands, f32 accumulation

    # Residual / LayerNorm path stays in f32 (v5e VPU/EUP have no bf16 path).
    x = x_ref[...]
    if x.dtype != jnp.float32:
        x = x.astype(jnp.float32)
    x = x.reshape(M, C)

    # ---------------- x + MultiHeadAttention(LayerNorm(x)) ----------------
    xn = _layernorm(x, ln1_g_ref[...], ln1_b_ref[...])

    # Fused QKV projection: one MXU push, N = 3*H*Dh, f32 accumulation.
    qkv = jnp.dot(xn.astype(mxu_dtype), wqkv_ref[...],
                  preferred_element_type=jnp.float32)            # (M, 3*hd) f32

    # Head split to (G, T, Dh) using only last-two-dim swaps (XLU) and
    # layout-preserving sublane reshapes (requires Dh % 8 == 0).
    qkv_t = jnp.swapaxes(qkv.reshape(Bt, T, 3 * hd), -1, -2)     # (Bt, 3*hd, T)

    def split_heads(col0):
        z = qkv_t[:, col0:col0 + hd, :]                          # (Bt, hd, T), 8-aligned sublane slice
        z = z.reshape(G, Dh, T)                                  # layout-preserving split
        return jnp.swapaxes(z, -1, -2)                           # (G, T, Dh)

    scale = 1.0 / (Dh ** 0.5)
    q = split_heads(0) * scale            # scale in f32 (not folded into bf16 weight)
    k = split_heads(hd)
    v = split_heads(2 * hd)

    # Fully head-batched scores / softmax / P@V (one batched op each).
    s = jnp.einsum('gqd,gkd->gqk', q, k,
                   preferred_element_type=jnp.float32)           # (G, T, T) f32
    row = jax.lax.broadcasted_iota(jnp.int32, (T, T), 0)
    col = jax.lax.broadcasted_iota(jnp.int32, (T, T), 1)
    s = jnp.where(col <= row, s, -1e30)                          # causal mask
    s = s - jnp.max(s, axis=-1, keepdims=True)
    p = jnp.exp(s)
    # approx reciprocal runs on the EUP slot; ~1e-3 rel. error vs exact softmax.
    p = p * pl.reciprocal(jnp.sum(p, axis=-1, keepdims=True), approx=True)

    att = jnp.einsum('gqk,gkd->gqd', p.astype(mxu_dtype), v.astype(mxu_dtype),
                     preferred_element_type=jnp.float32)         # (G, T, Dh) f32

    # Merge heads back to (M, hd) and do ONE output-projection matmul (K = hd).
    att = jnp.swapaxes(att, -1, -2).reshape(Bt, hd, T)           # layout-preserving merge
    att = jnp.swapaxes(att, -1, -2).reshape(M, hd)               # (M, hd)
    proj = jnp.dot(att.astype(mxu_dtype), wo_ref[...],
                   preferred_element_type=jnp.float32)           # (M, C)

    x1 = x + proj + bo_ref[...]          # bias broadcast added once over the full (M, C) slab

    # ---------------- x + FFN(LayerNorm(x)) ----------------
    x2n = _layernorm(x1, ln2_g_ref[...], ln2_b_ref[...])
    h1 = jnp.dot(x2n.astype(mxu_dtype), w1_ref[...],
                 preferred_element_type=jnp.float32) + b1_ref[...]
    h1 = jnp.maximum(h1, 0.0)            # ReLU (f32 on the VPU)
    h2 = jnp.dot(h1.astype(mxu_dtype), w2_ref[...],
                 preferred_element_type=jnp.float32) + b2_ref[...]

    out_ref[...] = (x1 + h2).reshape(Bt, T, C).astype(out_ref.dtype)


def transformer_block(x, params, *, n_heads, head_dim,
                      batch_tile=None, mxu_dtype=jnp.bfloat16,
                      single_buffer_weights=True):
    (ln1g, ln1b, wq, wk, wv, wo, bo, ln2g, ln2b, w1, b1, w2, b2) = params
    B, T, C = x.shape
    hd = n_heads * head_dim
    # In-kernel head split relies on layout-preserving sublane reshapes (f32 tile = 8 rows).
    assert head_dim % 8 == 0, "head_dim must be a multiple of 8"

    if batch_tile is None:
        # grid=1 on single-TC chips / small workloads (v5e, v6e, tiny batches on v7x):
        # no per-step overhead, maximal matmul M. Split into 2 "parallel" steps only
        # when each step still has >=256 rows (v7x: one per TensorCore; also lets the
        # x/out DMA pipeline against compute at large B*T).
        if B % 2 == 0 and (B // 2) * T >= 256:
            batch_tile = B // 2
        else:
            batch_tile = B
    assert B % batch_tile == 0, "batch must be divisible by batch_tile"
    grid_b = B // batch_tile

    # Fuse Wq/Wk/Wv and pre-cast MXU weights once in the wrapper: one QKV matmul in
    # the kernel and half the weight DMA bytes from HBM.
    wqkv = jnp.concatenate([wq, wk, wv], axis=1).astype(mxu_dtype)   # (C, 3*hd)
    wo_m = wo.astype(mxu_dtype)
    w1_m = w1.astype(mxu_dtype)
    w2_m = w2.astype(mxu_dtype)

    kernel = functools.partial(block_kernel, n_heads=n_heads, head_dim=head_dim)

    # Explicit scoped-VMEM limit sized to the footprint (defaults: 16 MiB v5e / 32 MiB
    # v6e,v7x), capped at v7x's 64 MiB per-TC physical VMEM.
    M = batch_tile * T
    est = (
        2 * (C * 3 * hd + hd * C + 8 * C * C)                        # bf16 weights
        + 4 * M * (4 * C + 4 * hd + 4 * C)                           # f32 activations/intermediates
        + 4 * n_heads * batch_tile * T * (2 * T + 3 * head_dim)     # scores + per-head q/k/v
        + 2 * 2 * batch_tile * T * C * x.dtype.itemsize             # double-buffered x/out blocks
        + (8 << 20)                                                  # headroom
    )
    vmem_limit = int(min(max(est, 32 << 20), 64 << 20))

    cparams = pltpu.CompilerParams(dimension_semantics=("parallel",),
                                   vmem_limit_bytes=vmem_limit)

    def build(use_single_buffer):
        def rep(shape):
            kw = {}
            if use_single_buffer:
                # Grid-invariant weights/biases: same block every step -> no need to
                # double-buffer the largest VMEM consumers.
                kw["pipeline_mode"] = pl.Buffered(1)
            return pl.BlockSpec(shape, lambda b: (0,) * len(shape), **kw)

        in_specs = [
            pl.BlockSpec((batch_tile, T, C), lambda b: (b, 0, 0)),   # x
            rep((1, C)), rep((1, C)),                                # LN1 gamma, beta
            rep((C, 3 * hd)),                                        # fused Wqkv (bf16)
            rep((hd, C)), rep((1, C)),                               # Wo (bf16), bo
            rep((1, C)), rep((1, C)),                                # LN2 gamma, beta
            rep((C, 4 * C)), rep((1, 4 * C)),                        # FFN W1 (bf16), b1
            rep((4 * C, C)), rep((1, C)),                            # FFN W2 (bf16), b2
        ]
        return pl.pallas_call(
            kernel,
            out_shape=jax.ShapeDtypeStruct((B, T, C), x.dtype),
            grid=(grid_b,),
            in_specs=in_specs,
            out_specs=pl.BlockSpec((batch_tile, T, C), lambda b: (b, 0, 0)),
            compiler_params=cparams,
        )

    args = (x, ln1g, ln1b, wqkv, wo_m, bo, ln2g, ln2b, w1_m, b1, w2_m, b2)
    if single_buffer_weights and hasattr(pl, "Buffered"):
        try:
            return build(True)(*args)
        except Exception:
            # pipeline_mode=pl.Buffered(1) not supported on this jax/Mosaic build;
            # fall back to default double-buffered weight blocks.
            pass
    return build(False)(*args)


def reference_block(x, params, *, n_heads, head_dim):
    (ln1g, ln1b, wq, wk, wv, wo, bo, ln2g, ln2b, w1, b1, w2, b2) = params
    B, T, C = x.shape

    def ln(y, g, b):
        mu = y.mean(-1, keepdims=True)
        var = ((y - mu) ** 2).mean(-1, keepdims=True)
        return (y - mu) / jnp.sqrt(var + 1e-5) * g + b

    xn = ln(x, ln1g, ln1b)
    q = (xn @ wq).reshape(B, T, n_heads, head_dim).transpose(0, 2, 1, 3)
    k = (xn @ wk).reshape(B, T, n_heads, head_dim).transpose(0, 2, 1, 3)
    v = (xn @ wv).reshape(B, T, n_heads, head_dim).transpose(0, 2, 1, 3)
    s = jnp.einsum("bhqd,bhkd->bhqk", q, k) / (head_dim ** 0.5)
    mask = jnp.tril(jnp.ones((T, T), bool))
    s = jnp.where(mask, s, -jnp.inf)
    p = jax.nn.softmax(s, axis=-1)
    att = jnp.einsum("bhqk,bhkd->bhqd", p, v).transpose(0, 2, 1, 3).reshape(B, T, -1)
    x1 = x + att @ wo + bo
    x2n = ln(x1, ln2g, ln2b)
    h = jax.nn.relu(x2n @ w1 + b1)
    return x1 + h @ w2 + b2


if __name__ == "__main__":
    # Block(embedding_dim=32, sequence_length=8, n_heads=4, heads_dim=8)
    B, T, C = 2, 8, 32
    n_heads, head_dim = 4, 8
    hd = n_heads * head_dim

    key = jax.random.PRNGKey(0)
    keys = jax.random.split(key, 10)
    init = lambda k, shape: (0.02 * jax.random.normal(k, shape)).astype(jnp.float32)

    params = (
        jnp.ones((1, C), jnp.float32),              # LN1 gamma
        jnp.zeros((1, C), jnp.float32),             # LN1 beta
        init(keys[0], (C, hd)),                     # Wq
        init(keys[1], (C, hd)),                     # Wk
        init(keys[2], (C, hd)),                     # Wv
        init(keys[3], (hd, C)),                     # Wo
        init(keys[4], (1, C)),                      # bo
        jnp.ones((1, C), jnp.float32),              # LN2 gamma
        jnp.zeros((1, C), jnp.float32),             # LN2 beta
        init(keys[5], (C, 4 * C)),                  # FFN W1
        init(keys[6], (1, 4 * C)),                  # b1
        init(keys[7], (4 * C, C)),                  # FFN W2
        init(keys[8], (1, C)),                      # b2
    )

    x = jax.random.normal(keys[9], (B, T, C), jnp.float32)

    out = transformer_block(x, params, n_heads=n_heads, head_dim=head_dim)
    out = jax.block_until_ready(out)

    ref = reference_block(x, params, n_heads=n_heads, head_dim=head_dim)
    assert out.shape == (B, T, C)
    # bf16 MXU operands (f32 accumulation) + approx softmax reciprocal -> slightly
    # looser tolerance than pure-f32.
    max_err = float(jnp.max(jnp.abs(out - ref)))
    assert jnp.allclose(out, ref, atol=2e-3, rtol=2e-3), max_err

    print("KERNEL_OK")
</pallas_src>

<mosaic_0001>
module attributes {stable_mosaic.version = 11 : i64} {
  func.func @block_kernel(%arg0: i32, %arg1: memref<2x8x32xf32, #tpu.memory_space<vmem>>, %arg2: memref<1x32xf32, #tpu.memory_space<vmem>>, %arg3: memref<1x32xf32, #tpu.memory_space<vmem>>, %arg4: memref<32x96xbf16, #tpu.memory_space<vmem>>, %arg5: memref<32x32xbf16, #tpu.memory_space<vmem>>, %arg6: memref<1x32xf32, #tpu.memory_space<vmem>>, %arg7: memref<1x32xf32, #tpu.memory_space<vmem>>, %arg8: memref<1x32xf32, #tpu.memory_space<vmem>>, %arg9: memref<32x128xbf16, #tpu.memory_space<vmem>>, %arg10: memref<1x128xf32, #tpu.memory_space<vmem>>, %arg11: memref<128x32xbf16, #tpu.memory_space<vmem>>, %arg12: memref<1x32xf32, #tpu.memory_space<vmem>>, %arg13: memref<2x8x32xf32, #tpu.memory_space<vmem>>) attributes {dimension_semantics = [#tpu.dimension_semantics<parallel>], iteration_bounds = array<i64: 1>, scalar_prefetch = 0 : i64, scratch_operands = 0 : i64, tpu.core_type = #tpu.core_type<tc>, window_params = [{transform_indices = @transform_0, window_bounds = array<i64: 2, 8, 32>}, {pipeline_mode = #tpu.pipeline_mode<synchronous>, transform_indices = @transform_1, window_bounds = array<i64: 1, 32>}, {pipeline_mode = #tpu.pipeline_mode<synchronous>, transform_indices = @transform_2, window_bounds = array<i64: 1, 32>}, {pipeline_mode = #tpu.pipeline_mode<synchronous>, transform_indices = @transform_3, window_bounds = array<i64: 32, 96>}, {pipeline_mode = #tpu.pipeline_mode<synchronous>, transform_indices = @transform_4, window_bounds = array<i64: 32, 32>}, {pipeline_mode = #tpu.pipeline_mode<synchronous>, transform_indices = @transform_5, window_bounds = array<i64: 1, 32>}, {pipeline_mode = #tpu.pipeline_mode<synchronous>, transform_indices = @transform_6, window_bounds = array<i64: 1, 32>}, {pipeline_mode = #tpu.pipeline_mode<synchronous>, transform_indices = @transform_7, window_bounds = array<i64: 1, 32>}, {pipeline_mode = #tpu.pipeline_mode<synchronous>, transform_indices = @transform_8, window_bounds = array<i64: 32, 128>}, {pipeline_mode = #tpu.pipeline_mode<synchronous>, transform_indices = @transform_9, window_bounds = array<i64: 1, 128>}, {pipeline_mode = #tpu.pipeline_mode<synchronous>, transform_indices = @transform_10, window_bounds = array<i64: 128, 32>}, {pipeline_mode = #tpu.pipeline_mode<synchronous>, transform_indices = @transform_11, window_bounds = array<i64: 1, 32>}, {transform_indices = @transform_12, window_bounds = array<i64: 2, 8, 32>}]} {
    %c0 = arith.constant 0 : index
    %c0_0 = arith.constant 0 : index
    %c0_1 = arith.constant 0 : index
    %0 = vector.load %arg1[%c0, %c0_0, %c0_1] : memref<2x8x32xf32, #tpu.memory_space<vmem>>, vector<2x8x32xf32>
    %1 = vector.shape_cast %0 : vector<2x8x32xf32> to vector<16x32xf32>
    %c0_2 = arith.constant 0 : index
    %c0_3 = arith.constant 0 : index
    %2 = vector.load %arg2[%c0_2, %c0_3] : memref<1x32xf32, #tpu.memory_space<vmem>>, vector<1x32xf32>
    %c0_4 = arith.constant 0 : index
    %c0_5 = arith.constant 0 : index
    %3 = vector.load %arg3[%c0_4, %c0_5] : memref<1x32xf32, #tpu.memory_space<vmem>>, vector<1x32xf32>
    %cst = arith.constant dense<0.000000e+00> : vector<16xf32>
    %4 = vector.multi_reduction <add>, %1, %cst [1] : vector<16x32xf32> to vector<16xf32>
    %5 = vector.shape_cast %4 : vector<16xf32> to vector<16x1xf32>
    %cst_6 = arith.constant 3.200000e+01 : f32
    %6 = vector.broadcast %cst_6 : f32 to vector<16x1xf32>
    %7 = arith.divf %5, %6 : vector<16x1xf32>
    %8 = vector.broadcast %7 : vector<16x1xf32> to vector<16x32xf32>
    %9 = arith.subf %1, %8 : vector<16x32xf32>
    %10 = arith.mulf %9, %9 : vector<16x32xf32>
    %cst_7 = arith.constant dense<0.000000e+00> : vector<16xf32>
    %11 = vector.multi_reduction <add>, %10, %cst_7 [1] : vector<16x32xf32> to vector<16xf32>
    %12 = vector.shape_cast %11 : vector<16xf32> to vector<16x1xf32>
    %cst_8 = arith.constant 3.200000e+01 : f32
    %13 = vector.broadcast %cst_8 : f32 to vector<16x1xf32>
    %14 = arith.divf %12, %13 : vector<16x1xf32>
    %15 = vector.broadcast %7 : vector<16x1xf32> to vector<16x32xf32>
    %16 = arith.subf %1, %15 : vector<16x32xf32>
    %cst_9 = arith.constant 9.99999974E-6 : f32
    %17 = vector.broadcast %cst_9 : f32 to vector<16x1xf32>
    %18 = arith.addf %14, %17 : vector<16x1xf32>
    %19 = math.rsqrt %18 : vector<16x1xf32>
    %20 = vector.broadcast %19 : vector<16x1xf32> to vector<16x32xf32>
    %21 = arith.mulf %16, %20 : vector<16x32xf32>
    %22 = vector.broadcast %2 : vector<1x32xf32> to vector<16x32xf32>
    %23 = arith.mulf %21, %22 : vector<16x32xf32>
    %24 = vector.broadcast %3 : vector<1x32xf32> to vector<16x32xf32>
    %25 = arith.addf %23, %24 : vector<16x32xf32>
    %26 = arith.truncf %25 : vector<16x32xf32> to vector<16x32xbf16>
    %c0_10 = arith.constant 0 : index
    %c0_11 = arith.constant 0 : index
    %27 = vector.load %arg4[%c0_10, %c0_11] : memref<32x96xbf16, #tpu.memory_space<vmem>>, vector<32x96xbf16>
    %cst_12 = arith.constant dense<0.000000e+00> : vector<16x96xf32>
    %28 = tpu.matmul %26, %27, %cst_12 {dimension_numbers = #tpu.dot_dimension_numbers<[1], [0], [0], [1], [0, 0, 1, 1], [], []>} : vector<16x32xbf16>, vector<32x96xbf16>, vector<16x96xf32> -> vector<16x96xf32>
    %29 = vector.shape_cast %28 : vector<16x96xf32> to vector<2x8x96xf32>
    %30 = tpu.transpose %29, [0, 2, 1] : vector<2x8x96xf32> -> vector<2x96x8xf32>
    %31 = vector.extract_strided_slice %30 {offsets = [0, 0, 0], sizes = [2, 32, 8], strides = [1, 1, 1]} : vector<2x96x8xf32> to vector<2x32x8xf32>
    %32 = vector.shape_cast %31 : vector<2x32x8xf32> to vector<8x8x8xf32>
    %33 = tpu.transpose %32, [0, 2, 1] : vector<8x8x8xf32> -> vector<8x8x8xf32>
    %cst_13 = arith.constant 0.353553385 : f32
    %34 = vector.broadcast %cst_13 : f32 to vector<8x8x8xf32>
    %35 = arith.mulf %33, %34 : vector<8x8x8xf32>
    %36 = vector.extract_strided_slice %30 {offsets = [0, 32, 0], sizes = [2, 32, 8], strides = [1, 1, 1]} : vector<2x96x8xf32> to vector<2x32x8xf32>
    %37 = vector.shape_cast %36 : vector<2x32x8xf32> to vector<8x8x8xf32>
    %38 = tpu.transpose %37, [0, 2, 1] : vector<8x8x8xf32> -> vector<8x8x8xf32>
    %39 = vector.extract_strided_slice %30 {offsets = [0, 64, 0], sizes = [2, 32, 8], strides = [1, 1, 1]} : vector<2x96x8xf32> to vector<2x32x8xf32>
    %40 = vector.shape_cast %39 : vector<2x32x8xf32> to vector<8x8x8xf32>
    %41 = tpu.transpose %40, [0, 2, 1] : vector<8x8x8xf32> -> vector<8x8x8xf32>
    "tpu.trace_start"() <{level = 10 : i32, message = "gqd,gkd->gqk"}> : () -> ()
    %cst_14 = arith.constant dense<0.000000e+00> : vector<8x8x8xf32>
    %42 = tpu.matmul %35, %38, %cst_14 {dimension_numbers = #tpu.dot_dimension_numbers<[2], [2], [1], [1], [0, 0, 0, 1, 1, 1], [0], [0]>} : vector<8x8x8xf32>, vector<8x8x8xf32>, vector<8x8x8xf32> -> vector<8x8x8xf32>
    "tpu.trace_stop"() : () -> ()
    %43 = tpu.iota {dimensions = array<i32: 0>} : vector<8x8xi32>
    %44 = tpu.iota {dimensions = array<i32: 1>} : vector<8x8xi32>
    %45 = arith.cmpi sle, %44, %43 : vector<8x8xi32>
    %cst_15 = arith.constant -1.000000e+30 : f32
    %46 = vector.shape_cast %45 : vector<8x8xi1> to vector<1x8x8xi1>
    %47 = vector.broadcast %46 : vector<1x8x8xi1> to vector<8x8x8xi1>
    %48 = vector.broadcast %cst_15 : f32 to vector<8x8x8xf32>
    %49 = arith.select %47, %42, %48 : vector<8x8x8xi1>, vector<8x8x8xf32>
    %cst_16 = arith.constant dense<0xFF800000> : vector<8x8xf32>
    %50 = vector.multi_reduction <maximumf>, %49, %cst_16 [2] : vector<8x8x8xf32> to vector<8x8xf32>
    %51 = vector.shape_cast %50 : vector<8x8xf32> to vector<8x8x1xf32>
    %52 = vector.broadcast %51 : vector<8x8x1xf32> to vector<8x8x8xf32>
    %53 = arith.subf %49, %52 : vector<8x8x8xf32>
    %54 = math.exp %53 : vector<8x8x8xf32>
    %cst_17 = arith.constant dense<0.000000e+00> : vector<8x8xf32>
    %55 = vector.multi_reduction <add>, %54, %cst_17 [2] : vector<8x8x8xf32> to vector<8x8xf32>
    %56 = vector.shape_cast %55 : vector<8x8xf32> to vector<8x8x1xf32>
    %57 = tpu.reciprocal %56 {approx = true} : vector<8x8x1xf32> -> vector<8x8x1xf32>
    %58 = vector.broadcast %57 : vector<8x8x1xf32> to vector<8x8x8xf32>
    %59 = arith.mulf %54, %58 : vector<8x8x8xf32>
    %60 = arith.truncf %59 : vector<8x8x8xf32> to vector<8x8x8xbf16>
    %61 = arith.truncf %41 : vector<8x8x8xf32> to vector<8x8x8xbf16>
    "tpu.trace_start"() <{level = 10 : i32, message = "gqk,gkd->gqd"}> : () -> ()
    %cst_18 = arith.constant dense<0.000000e+00> : vector<8x8x8xf32>
    %62 = tpu.matmul %60, %61, %cst_18 {dimension_numbers = #tpu.dot_dimension_numbers<[2], [1], [1], [2], [0, 0, 0, 1, 1, 2], [0], [0]>} : vector<8x8x8xbf16>, vector<8x8x8xbf16>, vector<8x8x8xf32> -> vector<8x8x8xf32>
    "tpu.trace_stop"() : () -> ()
    %63 = tpu.transpose %62, [0, 2, 1] : vector<8x8x8xf32> -> vector<8x8x8xf32>
    %64 = vector.shape_cast %63 : vector<8x8x8xf32> to vector<2x32x8xf32>
    %65 = tpu.transpose %64, [0, 2, 1] : vector<2x32x8xf32> -> vector<2x8x32xf32>
    %66 = vector.shape_cast %65 : vector<2x8x32xf32> to vector<16x32xf32>
    %67 = arith.truncf %66 : vector<16x32xf32> to vector<16x32xbf16>
    %c0_19 = arith.constant 0 : index
    %c0_20 = arith.constant 0 : index
    %68 = vector.load %arg5[%c0_19, %c0_20] : memref<32x32xbf16, #tpu.memory_space<vmem>>, vector<32x32xbf16>
    %cst_21 = arith.constant dense<0.000000e+00> : vector<16x32xf32>
    %69 = tpu.matmul %67, %68, %cst_21 {dimension_numbers = #tpu.dot_dimension_numbers<[1], [0], [0], [1], [0, 0, 1, 1], [], []>} : vector<16x32xbf16>, vector<32x32xbf16>, vector<16x32xf32> -> vector<16x32xf32>
    %70 = arith.addf %1, %69 : vector<16x32xf32>
    %c0_22 = arith.constant 0 : index
    %c0_23 = arith.constant 0 : index
    %71 = vector.load %arg6[%c0_22, %c0_23] : memref<1x32xf32, #tpu.memory_space<vmem>>, vector<1x32xf32>
    %72 = vector.broadcast %71 : vector<1x32xf32> to vector<16x32xf32>
    %73 = arith.addf %70, %72 : vector<16x32xf32>
    %c0_24 = arith.constant 0 : index
    %c0_25 = arith.constant 0 : index
    %74 = vector.load %arg7[%c0_24, %c0_25] : memref<1x32xf32, #tpu.memory_space<vmem>>, vector<1x32xf32>
    %c0_26 = arith.constant 0 : index
    %c0_27 = arith.constant 0 : index
    %75 = vector.load %arg8[%c0_26, %c0_27] : memref<1x32xf32, #tpu.memory_space<vmem>>, vector<1x32xf32>
    %cst_28 = arith.constant dense<0.000000e+00> : vector<16xf32>
    %76 = vector.multi_reduction <add>, %73, %cst_28 [1] : vector<16x32xf32> to vector<16xf32>
    %77 = vector.shape_cast %76 : vector<16xf32> to vector<16x1xf32>
    %cst_29 = arith.constant 3.200000e+01 : f32
    %78 = vector.broadcast %cst_29 : f32 to vector<16x1xf32>
    %79 = arith.divf %77, %78 : vector<16x1xf32>
    %80 = vector.broadcast %79 : vector<16x1xf32> to vector<16x32xf32>
    %81 = arith.subf %73, %80 : vector<16x32xf32>
    %82 = arith.mulf %81, %81 : vector<16x32xf32>
    %cst_30 = arith.constant dense<0.000000e+00> : vector<16xf32>
    %83 = vector.multi_reduction <add>, %82, %cst_30 [1] : vector<16x32xf32> to vector<16xf32>
    %84 = vector.shape_cast %83 : vector<16xf32> to vector<16x1xf32>
    %cst_31 = arith.constant 3.200000e+01 : f32
    %85 = vector.broadcast %cst_31 : f32 to vector<16x1xf32>
    %86 = arith.divf %84, %85 : vector<16x1xf32>
    %87 = vector.broadcast %79 : vector<16x1xf32> to vector<16x32xf32>
    %88 = arith.subf %73, %87 : vector<16x32xf32>
    %cst_32 = arith.constant 9.99999974E-6 : f32
    %89 = vector.broadcast %cst_32 : f32 to vector<16x1xf32>
    %90 = arith.addf %86, %89 : vector<16x1xf32>
    %91 = math.rsqrt %90 : vector<16x1xf32>
    %92 = vector.broadcast %91 : vector<16x1xf32> to vector<16x32xf32>
    %93 = arith.mulf %88, %92 : vector<16x32xf32>
    %94 = vector.broadcast %74 : vector<1x32xf32> to vector<16x32xf32>
    %95 = arith.mulf %93, %94 : vector<16x32xf32>
    %96 = vector.broadcast %75 : vector<1x32xf32> to vector<16x32xf32>
    %97 = arith.addf %95, %96 : vector<16x32xf32>
    %98 = arith.truncf %97 : vector<16x32xf32> to vector<16x32xbf16>
    %c0_33 = arith.constant 0 : index
    %c0_34 = arith.constant 0 : index
    %99 = vector.load %arg9[%c0_33, %c0_34] : memref<32x128xbf16, #tpu.memory_space<vmem>>, vector<32x128xbf16>
    %cst_35 = arith.constant dense<0.000000e+00> : vector<16x128xf32>
    %100 = tpu.matmul %98, %99, %cst_35 {dimension_numbers = #tpu.dot_dimension_numbers<[1], [0], [0], [1], [0, 0, 1, 1], [], []>} : vector<16x32xbf16>, vector<32x128xbf16>, vector<16x128xf32> -> vector<16x128xf32>
    %c0_36 = arith.constant 0 : index
    %c0_37 = arith.constant 0 : index
    %101 = vector.load %arg10[%c0_36, %c0_37] : memref<1x128xf32, #tpu.memory_space<vmem>>, vector<1x128xf32>
    %102 = vector.broadcast %101 : vector<1x128xf32> to vector<16x128xf32>
    %103 = arith.addf %100, %102 : vector<16x128xf32>
    %cst_38 = arith.constant 0.000000e+00 : f32
    %104 = vector.broadcast %cst_38 : f32 to vector<16x128xf32>
    %105 = arith.maximumf %103, %104 : vector<16x128xf32>
    %106 = arith.truncf %105 : vector<16x128xf32> to vector<16x128xbf16>
    %c0_39 = arith.constant 0 : index
    %c0_40 = arith.constant 0 : index
    %107 = vector.load %arg11[%c0_39, %c0_40] : memref<128x32xbf16, #tpu.memory_space<vmem>>, vector<128x32xbf16>
    %cst_41 = arith.constant dense<0.000000e+00> : vector<16x32xf32>
    %108 = tpu.matmul %106, %107, %cst_41 {dimension_numbers = #tpu.dot_dimension_numbers<[1], [0], [0], [1], [0, 0, 1, 1], [], []>} : vector<16x128xbf16>, vector<128x32xbf16>, vector<16x32xf32> -> vector<16x32xf32>
    %c0_42 = arith.constant 0 : index
    %c0_43 = arith.constant 0 : index
    %109 = vector.load %arg12[%c0_42, %c0_43] : memref<1x32xf32, #tpu.memory_space<vmem>>, vector<1x32xf32>
    %110 = vector.broadcast %109 : vector<1x32xf32> to vector<16x32xf32>
    %111 = arith.addf %108, %110 : vector<16x32xf32>
    %112 = arith.addf %73, %111 : vector<16x32xf32>
    %113 = vector.shape_cast %112 : vector<16x32xf32> to vector<2x8x32xf32>
    %c0_44 = arith.constant 0 : index
    %c0_45 = arith.constant 0 : index
    %c0_46 = arith.constant 0 : index
    %114 = vector.load %arg13[%c0_44, %c0_45, %c0_46] : memref<2x8x32xf32, #tpu.memory_space<vmem>>, vector<2x8x32xf32>
    tpu.vector_store %arg13[%c0_44, %c0_45, %c0_46], %113 {strides = array<i32>} : memref<2x8x32xf32, #tpu.memory_space<vmem>>, vector<2x8x32xf32>,
    return
  }
  func.func @transform_0(%arg0: i32) -> (i32, i32, i32) {
    %c0_i32 = arith.constant 0 : i32
    %c0_i32_0 = arith.constant 0 : i32
    %c0_i32_1 = arith.constant 0 : i32
    return %arg0, %c0_i32, %c0_i32_0 : i32, i32, i32
  }
  func.func @transform_1(%arg0: i32) -> (i32, i32) {
    %c0_i32 = arith.constant 0 : i32
    %c0_i32_0 = arith.constant 0 : i32
    %c0_i32_1 = arith.constant 0 : i32
    return %c0_i32, %c0_i32_0 : i32, i32
  }
  func.func @transform_2(%arg0: i32) -> (i32, i32) {
    %c0_i32 = arith.constant 0 : i32
    %c0_i32_0 = arith.constant 0 : i32
    %c0_i32_1 = arith.constant 0 : i32
    return %c0_i32, %c0_i32_0 : i32, i32
  }
  func.func @transform_3(%arg0: i32) -> (i32, i32) {
    %c0_i32 = arith.constant 0 : i32
    %c0_i32_0 = arith.constant 0 : i32
    %c0_i32_1 = arith.constant 0 : i32
    return %c0_i32, %c0_i32_0 : i32, i32
  }
  func.func @transform_4(%arg0: i32) -> (i32, i32) {
    %c0_i32 = arith.constant 0 : i32
    %c0_i32_0 = arith.constant 0 : i32
    %c0_i32_1 = arith.constant 0 : i32
    return %c0_i32, %c0_i32_0 : i32, i32
  }
  func.func @transform_5(%arg0: i32) -> (i32, i32) {
    %c0_i32 = arith.constant 0 : i32
    %c0_i32_0 = arith.constant 0 : i32
    %c0_i32_1 = arith.constant 0 : i32
    return %c0_i32, %c0_i32_0 : i32, i32
  }
  func.func @transform_6(%arg0: i32) -> (i32, i32) {
    %c0_i32 = arith.constant 0 : i32
    %c0_i32_0 = arith.constant 0 : i32
    %c0_i32_1 = arith.constant 0 : i32
    return %c0_i32, %c0_i32_0 : i32, i32
  }
  func.func @transform_7(%arg0: i32) -> (i32, i32) {
    %c0_i32 = arith.constant 0 : i32
    %c0_i32_0 = arith.constant 0 : i32
    %c0_i32_1 = arith.constant 0 : i32
    return %c0_i32, %c0_i32_0 : i32, i32
  }
  func.func @transform_8(%arg0: i32) -> (i32, i32) {
    %c0_i32 = arith.constant 0 : i32
    %c0_i32_0 = arith.constant 0 : i32
    %c0_i32_1 = arith.constant 0 : i32
    return %c0_i32, %c0_i32_0 : i32, i32
  }
  func.func @transform_9(%arg0: i32) -> (i32, i32) {
    %c0_i32 = arith.constant 0 : i32
    %c0_i32_0 = arith.constant 0 : i32
    %c0_i32_1 = arith.constant 0 : i32
    return %c0_i32, %c0_i32_0 : i32, i32
  }
  func.func @transform_10(%arg0: i32) -> (i32, i32) {
    %c0_i32 = arith.constant 0 : i32
    %c0_i32_0 = arith.constant 0 : i32
    %c0_i32_1 = arith.constant 0 : i32
    return %c0_i32, %c0_i32_0 : i32, i32
  }
  func.func @transform_11(%arg0: i32) -> (i32, i32) {
    %c0_i32 = arith.constant 0 : i32
    %c0_i32_0 = arith.constant 0 : i32
    %c0_i32_1 = arith.constant 0 : i32
    return %c0_i32, %c0_i32_0 : i32, i32
  }
  func.func @transform_12(%arg0: i32) -> (i32, i32, i32) {
    %c0_i32 = arith.constant 0 : i32
    %c0_i32_0 = arith.constant 0 : i32
    %c0_i32_1 = arith.constant 0 : i32
    return %arg0, %c0_i32, %c0_i32_0 : i32, i32, i32
  }
}

module attributes {stable_mosaic.version = 11 : i64} {
  func.func @block_kernel(%arg0: i32, %arg1: memref<2x8x32xf32, #tpu.memory_space<vmem>>, %arg2: memref<1x32xf32, #tpu.memory_space<vmem>>, %arg3: memref<1x32xf32, #tpu.memory_space<vmem>>, %arg4: memref<32x96xbf16, #tpu.memory_space<vmem>>, %arg5: memref<32x32xbf16, #tpu.memory_space<vmem>>, %arg6: memref<1x32xf32, #tpu.memory_space<vmem>>, %arg7: memref<1x32xf32, #tpu.memory_space<vmem>>, %arg8: memref<1x32xf32, #tpu.memory_space<vmem>>, %arg9: memref<32x128xbf16, #tpu.memory_space<vmem>>, %arg10: memref<1x128xf32, #tpu.memory_space<vmem>>, %arg11: memref<128x32xbf16, #tpu.memory_space<vmem>>, %arg12: memref<1x32xf32, #tpu.memory_space<vmem>>, %arg13: memref<2x8x32xf32, #tpu.memory_space<vmem>>) attributes {dimension_semantics = [#tpu.dimension_semantics<parallel>], iteration_bounds = array<i64: 1>, scalar_prefetch = 0 : i64, scratch_operands = 0 : i64, tpu.core_type = #tpu.core_type<tc>, window_params = [{transform_indices = @transform_0, window_bounds = array<i64: 2, 8, 32>}, {pipeline_mode = #tpu.pipeline_mode<synchronous>, transform_indices = @transform_1, window_bounds = array<i64: 1, 32>}, {pipeline_mode = #tpu.pipeline_mode<synchronous>, transform_indices = @transform_2, window_bounds = array<i64: 1, 32>}, {pipeline_mode = #tpu.pipeline_mode<synchronous>, transform_indices = @transform_3, window_bounds = array<i64: 32, 96>}, {pipeline_mode = #tpu.pipeline_mode<synchronous>, transform_indices = @transform_4, window_bounds = array<i64: 32, 32>}, {pipeline_mode = #tpu.pipeline_mode<synchronous>, transform_indices = @transform_5, window_bounds = array<i64: 1, 32>}, {pipeline_mode = #tpu.pipeline_mode<synchronous>, transform_indices = @transform_6, window_bounds = array<i64: 1, 32>}, {pipeline_mode = #tpu.pipeline_mode<synchronous>, transform_indices = @transform_7, window_bounds = array<i64: 1, 32>}, {pipeline_mode = #tpu.pipeline_mode<synchronous>, transform_indices = @transform_8, window_bounds = array<i64: 32, 128>}, {pipeline_mode = #tpu.pipeline_mode<synchronous>, transform_indices = @transform_9, window_bounds = array<i64: 1, 128>}, {pipeline_mode = #tpu.pipeline_mode<synchronous>, transform_indices = @transform_10, window_bounds = array<i64: 128, 32>}, {pipeline_mode = #tpu.pipeline_mode<synchronous>, transform_indices = @transform_11, window_bounds = array<i64: 1, 32>}, {transform_indices = @transform_12, window_bounds = array<i64: 2, 8, 32>}]} {
    %c0 = arith.constant 0 : index
    %c0_0 = arith.constant 0 : index
    %c0_1 = arith.constant 0 : index
    %0 = vector.load %arg1[%c0, %c0_0, %c0_1] : memref<2x8x32xf32, #tpu.memory_space<vmem>>, vector<2x8x32xf32>
    %1 = vector.shape_cast %0 : vector<2x8x32xf32> to vector<16x32xf32>
    %c0_2 = arith.constant 0 : index
    %c0_3 = arith.constant 0 : index
    %2 = vector.load %arg2[%c0_2, %c0_3] : memref<1x32xf32, #tpu.memory_space<vmem>>, vector<1x32xf32>
    %c0_4 = arith.constant 0 : index
    %c0_5 = arith.constant 0 : index
    %3 = vector.load %arg3[%c0_4, %c0_5] : memref<1x32xf32, #tpu.memory_space<vmem>>, vector<1x32xf32>
    %cst = arith.constant dense<0.000000e+00> : vector<16xf32>
    %4 = vector.multi_reduction <add>, %1, %cst [1] : vector<16x32xf32> to vector<16xf32>
    %5 = vector.shape_cast %4 : vector<16xf32> to vector<16x1xf32>
    %cst_6 = arith.constant 3.200000e+01 : f32
    %6 = vector.broadcast %cst_6 : f32 to vector<16x1xf32>
    %7 = arith.divf %5, %6 : vector<16x1xf32>
    %8 = vector.broadcast %7 : vector<16x1xf32> to vector<16x32xf32>
    %9 = arith.subf %1, %8 : vector<16x32xf32>
    %10 = arith.mulf %9, %9 : vector<16x32xf32>
    %cst_7 = arith.constant dense<0.000000e+00> : vector<16xf32>
    %11 = vector.multi_reduction <add>, %10, %cst_7 [1] : vector<16x32xf32> to vector<16xf32>
    %12 = vector.shape_cast %11 : vector<16xf32> to vector<16x1xf32>
    %cst_8 = arith.constant 3.200000e+01 : f32
    %13 = vector.broadcast %cst_8 : f32 to vector<16x1xf32>
    %14 = arith.divf %12, %13 : vector<16x1xf32>
    %15 = vector.broadcast %7 : vector<16x1xf32> to vector<16x32xf32>
    %16 = arith.subf %1, %15 : vector<16x32xf32>
    %cst_9 = arith.constant 9.99999974E-6 : f32
    %17 = vector.broadcast %cst_9 : f32 to vector<16x1xf32>
    %18 = arith.addf %14, %17 : vector<16x1xf32>
    %19 = math.rsqrt %18 : vector<16x1xf32>
    %20 = vector.broadcast %19 : vector<16x1xf32> to vector<16x32xf32>
    %21 = arith.mulf %16, %20 : vector<16x32xf32>
    %22 = vector.broadcast %2 : vector<1x32xf32> to vector<16x32xf32>
    %23 = arith.mulf %21, %22 : vector<16x32xf32>
    %24 = vector.broadcast %3 : vector<1x32xf32> to vector<16x32xf32>
    %25 = arith.addf %23, %24 : vector<16x32xf32>
    %26 = arith.truncf %25 : vector<16x32xf32> to vector<16x32xbf16>
    %c0_10 = arith.constant 0 : index
    %c0_11 = arith.constant 0 : index
    %27 = vector.load %arg4[%c0_10, %c0_11] : memref<32x96xbf16, #tpu.memory_space<vmem>>, vector<32x96xbf16>
    %cst_12 = arith.constant dense<0.000000e+00> : vector<16x96xf32>
    %28 = tpu.matmul %26, %27, %cst_12 {dimension_numbers = #tpu.dot_dimension_numbers<[1], [0], [0], [1], [0, 0, 1, 1], [], []>} : vector<16x32xbf16>, vector<32x96xbf16>, vector<16x96xf32> -> vector<16x96xf32>
    %29 = vector.shape_cast %28 : vector<16x96xf32> to vector<2x8x96xf32>
    %30 = tpu.transpose %29, [0, 2, 1] : vector<2x8x96xf32> -> vector<2x96x8xf32>
    %31 = vector.extract_strided_slice %30 {offsets = [0, 0, 0], sizes = [2, 32, 8], strides = [1, 1, 1]} : vector<2x96x8xf32> to vector<2x32x8xf32>
    %32 = vector.shape_cast %31 : vector<2x32x8xf32> to vector<8x8x8xf32>
    %33 = tpu.transpose %32, [0, 2, 1] : vector<8x8x8xf32> -> vector<8x8x8xf32>
    %cst_13 = arith.constant 0.353553385 : f32
    %34 = vector.broadcast %cst_13 : f32 to vector<8x8x8xf32>
    %35 = arith.mulf %33, %34 : vector<8x8x8xf32>
    %36 = vector.extract_strided_slice %30 {offsets = [0, 32, 0], sizes = [2, 32, 8], strides = [1, 1, 1]} : vector<2x96x8xf32> to vector<2x32x8xf32>
    %37 = vector.shape_cast %36 : vector<2x32x8xf32> to vector<8x8x8xf32>
    %38 = tpu.transpose %37, [0, 2, 1] : vector<8x8x8xf32> -> vector<8x8x8xf32>
    %39 = vector.extract_strided_slice %30 {offsets = [0, 64, 0], sizes = [2, 32, 8], strides = [1, 1, 1]} : vector<2x96x8xf32> to vector<2x32x8xf32>
    %40 = vector.shape_cast %39 : vector<2x32x8xf32> to vector<8x8x8xf32>
    %41 = tpu.transpose %40, [0, 2, 1] : vector<8x8x8xf32> -> vector<8x8x8xf32>
    "tpu.trace_start"() <{level = 10 : i32, message = "gqd,gkd->gqk"}> : () -> ()
    %cst_14 = arith.constant dense<0.000000e+00> : vector<8x8x8xf32>
    %42 = tpu.matmul %35, %38, %cst_14 {dimension_numbers = #tpu.dot_dimension_numbers<[2], [2], [1], [1], [0, 0, 0, 1, 1, 1], [0], [0]>} : vector<8x8x8xf32>, vector<8x8x8xf32>, vector<8x8x8xf32> -> vector<8x8x8xf32>
    "tpu.trace_stop"() : () -> ()
    %43 = tpu.iota {dimensions = array<i32: 0>} : vector<8x8xi32>
    %44 = tpu.iota {dimensions = array<i32: 1>} : vector<8x8xi32>
    %45 = arith.cmpi sle, %44, %43 : vector<8x8xi32>
    %cst_15 = arith.constant -1.000000e+30 : f32
    %46 = vector.shape_cast %45 : vector<8x8xi1> to vector<1x8x8xi1>
    %47 = vector.broadcast %46 : vector<1x8x8xi1> to vector<8x8x8xi1>
    %48 = vector.broadcast %cst_15 : f32 to vector<8x8x8xf32>
    %49 = arith.select %47, %42, %48 : vector<8x8x8xi1>, vector<8x8x8xf32>
    %cst_16 = arith.constant dense<0xFF800000> : vector<8x8xf32>
    %50 = vector.multi_reduction <maximumf>, %49, %cst_16 [2] : vector<8x8x8xf32> to vector<8x8xf32>
    %51 = vector.shape_cast %50 : vector<8x8xf32> to vector<8x8x1xf32>
    %52 = vector.broadcast %51 : vector<8x8x1xf32> to vector<8x8x8xf32>
    %53 = arith.subf %49, %52 : vector<8x8x8xf32>
    %54 = math.exp %53 : vector<8x8x8xf32>
    %cst_17 = arith.constant dense<0.000000e+00> : vector<8x8xf32>
    %55 = vector.multi_reduction <add>, %54, %cst_17 [2] : vector<8x8x8xf32> to vector<8x8xf32>
    %56 = vector.shape_cast %55 : vector<8x8xf32> to vector<8x8x1xf32>
    %57 = tpu.reciprocal %56 {approx = true} : vector<8x8x1xf32> -> vector<8x8x1xf32>
    %58 = vector.broadcast %57 : vector<8x8x1xf32> to vector<8x8x8xf32>
    %59 = arith.mulf %54, %58 : vector<8x8x8xf32>
    %60 = arith.truncf %59 : vector<8x8x8xf32> to vector<8x8x8xbf16>
    %61 = arith.truncf %41 : vector<8x8x8xf32> to vector<8x8x8xbf16>
    "tpu.trace_start"() <{level = 10 : i32, message = "gqk,gkd->gqd"}> : () -> ()
    %cst_18 = arith.constant dense<0.000000e+00> : vector<8x8x8xf32>
    %62 = tpu.matmul %60, %61, %cst_18 {dimension_numbers = #tpu.dot_dimension_numbers<[2], [1], [1], [2], [0, 0, 0, 1, 1, 2], [0], [0]>} : vector<8x8x8xbf16>, vector<8x8x8xbf16>, vector<8x8x8xf32> -> vector<8x8x8xf32>
    "tpu.trace_stop"() : () -> ()
    %63 = tpu.transpose %62, [0, 2, 1] : vector<8x8x8xf32> -> vector<8x8x8xf32>
    %64 = vector.shape_cast %63 : vector<8x8x8xf32> to vector<2x32x8xf32>
    %65 = tpu.transpose %64, [0, 2, 1] : vector<2x32x8xf32> -> vector<2x8x32xf32>
    %66 = vector.shape_cast %65 : vector<2x8x32xf32> to vector<16x32xf32>
    %67 = arith.truncf %66 : vector<16x32xf32> to vector<16x32xbf16>
    %c0_19 = arith.constant 0 : index
    %c0_20 = arith.constant 0 : index
    %68 = vector.load %arg5[%c0_19, %c0_20] : memref<32x32xbf16, #tpu.memory_space<vmem>>, vector<32x32xbf16>
    %cst_21 = arith.constant dense<0.000000e+00> : vector<16x32xf32>
    %69 = tpu.matmul %67, %68, %cst_21 {dimension_numbers = #tpu.dot_dimension_numbers<[1], [0], [0], [1], [0, 0, 1, 1], [], []>} : vector<16x32xbf16>, vector<32x32xbf16>, vector<16x32xf32> -> vector<16x32xf32>
    %70 = arith.addf %1, %69 : vector<16x32xf32>
    %c0_22 = arith.constant 0 : index
    %c0_23 = arith.constant 0 : index
    %71 = vector.load %arg6[%c0_22, %c0_23] : memref<1x32xf32, #tpu.memory_space<vmem>>, vector<1x32xf32>
    %72 = vector.broadcast %71 : vector<1x32xf32> to vector<16x32xf32>
    %73 = arith.addf %70, %72 : vector<16x32xf32>
    %c0_24 = arith.constant 0 : index
    %c0_25 = arith.constant 0 : index
    %74 = vector.load %arg7[%c0_24, %c0_25] : memref<1x32xf32, #tpu.memory_space<vmem>>, vector<1x32xf32>
    %c0_26 = arith.constant 0 : index
    %c0_27 = arith.constant 0 : index
    %75 = vector.load %arg8[%c0_26, %c0_27] : memref<1x32xf32, #tpu.memory_space<vmem>>, vector<1x32xf32>
    %cst_28 = arith.constant dense<0.000000e+00> : vector<16xf32>
    %76 = vector.multi_reduction <add>, %73, %cst_28 [1] : vector<16x32xf32> to vector<16xf32>
    %77 = vector.shape_cast %76 : vector<16xf32> to vector<16x1xf32>
    %cst_29 = arith.constant 3.200000e+01 : f32
    %78 = vector.broadcast %cst_29 : f32 to vector<16x1xf32>
    %79 = arith.divf %77, %78 : vector<16x1xf32>
    %80 = vector.broadcast %79 : vector<16x1xf32> to vector<16x32xf32>
    %81 = arith.subf %73, %80 : vector<16x32xf32>
    %82 = arith.mulf %81, %81 : vector<16x32xf32>
    %cst_30 = arith.constant dense<0.000000e+00> : vector<16xf32>
    %83 = vector.multi_reduction <add>, %82, %cst_30 [1] : vector<16x32xf32> to vector<16xf32>
    %84 = vector.shape_cast %83 : vector<16xf32> to vector<16x1xf32>
    %cst_31 = arith.constant 3.200000e+01 : f32
    %85 = vector.broadcast %cst_31 : f32 to vector<16x1xf32>
    %86 = arith.divf %84, %85 : vector<16x1xf32>
    %87 = vector.broadcast %79 : vector<16x1xf32> to vector<16x32xf32>
    %88 = arith.subf %73, %87 : vector<16x32xf32>
    %cst_32 = arith.constant 9.99999974E-6 : f32
    %89 = vector.broadcast %cst_32 : f32 to vector<16x1xf32>
    %90 = arith.addf %86, %89 : vector<16x1xf32>
    %91 = math.rsqrt %90 : vector<16x1xf32>
    %92 = vector.broadcast %91 : vector<16x1xf32> to vector<16x32xf32>
    %93 = arith.mulf %88, %92 : vector<16x32xf32>
    %94 = vector.broadcast %74 : vector<1x32xf32> to vector<16x32xf32>
    %95 = arith.mulf %93, %94 : vector<16x32xf32>
    %96 = vector.broadcast %75 : vector<1x32xf32> to vector<16x32xf32>
    %97 = arith.addf %95, %96 : vector<16x32xf32>
    %98 = arith.truncf %97 : vector<16x32xf32> to vector<16x32xbf16>
    %c0_33 = arith.constant 0 : index
    %c0_34 = arith.constant 0 : index
    %99 = vector.load %arg9[%c0_33, %c0_34] : memref<32x128xbf16, #tpu.memory_space<vmem>>, vector<32x128xbf16>
    %cst_35 = arith.constant dense<0.000000e+00> : vector<16x128xf32>
    %100 = tpu.matmul %98, %99, %cst_35 {dimension_numbers = #tpu.dot_dimension_numbers<[1], [0], [0], [1], [0, 0, 1, 1], [], []>} : vector<16x32xbf16>, vector<32x128xbf16>, vector<16x128xf32> -> vector<16x128xf32>
    %c0_36 = arith.constant 0 : index
    %c0_37 = arith.constant 0 : index
    %101 = vector.load %arg10[%c0_36, %c0_37] : memref<1x128xf32, #tpu.memory_space<vmem>>, vector<1x128xf32>
    %102 = vector.broadcast %101 : vector<1x128xf32> to vector<16x128xf32>
    %103 = arith.addf %100, %102 : vector<16x128xf32>
    %cst_38 = arith.constant 0.000000e+00 : f32
    %104 = vector.broadcast %cst_38 : f32 to vector<16x128xf32>
    %105 = arith.maximumf %103, %104 : vector<16x128xf32>
    %106 = arith.truncf %105 : vector<16x128xf32> to vector<16x128xbf16>
    %c0_39 = arith.constant 0 : index
    %c0_40 = arith.constant 0 : index
    %107 = vector.load %arg11[%c0_39, %c0_40] : memref<128x32xbf16, #tpu.memory_space<vmem>>, vector<128x32xbf16>
    %cst_41 = arith.constant dense<0.000000e+00> : vector<16x32xf32>
    %108 = tpu.matmul %106, %107, %cst_41 {dimension_numbers = #tpu.dot_dimension_numbers<[1], [0], [0], [1], [0, 0, 1, 1], [], []>} : vector<16x128xbf16>, vector<128x32xbf16>, vector<16x32xf32> -> vector<16x32xf32>
    %c0_42 = arith.constant 0 : index
    %c0_43 = arith.constant 0 : index
    %109 = vector.load %arg12[%c0_42, %c0_43] : memref<1x32xf32, #tpu.memory_space<vmem>>, vector<1x32xf32>
    %110 = vector.broadcast %109 : vector<1x32xf32> to vector<16x32xf32>
    %111 = arith.addf %108, %110 : vector<16x32xf32>
    %112 = arith.addf %73, %111 : vector<16x32xf32>
    %113 = vector.shape_cast %112 : vector<16x32xf32> to vector<2x8x32xf32>
    %c0_44 = arith.constant 0 : index
    %c0_45 = arith.constant 0 : index
    %c0_46 = arith.constant 0 : index
    %114 = vector.load %arg13[%c0_44, %c0_45, %c0_46] : memref<2x8x32xf32, #tpu.memory_space<vmem>>, vector<2x8x32xf32>
    tpu.vector_store %arg13[%c0_44, %c0_45, %c0_46], %113 {strides = array<i32>} : memref<2x8x32xf32, #tpu.memory_space<vmem>>, vector<2x8x32xf32>,
    return
  }
  func.func @transform_0(%arg0: i32) -> (i32, i32, i32) {
    %c0_i32 = arith.constant 0 : i32
    %c0_i32_0 = arith.constant 0 : i32
    %c0_i32_1 = arith.constant 0 : i32
    return %arg0, %c0_i32, %c0_i32_0 : i32, i32, i32
  }
  func.func @transform_1(%arg0: i32) -> (i32, i32) {
    %c0_i32 = arith.constant 0 : i32
    %c0_i32_0 = arith.constant 0 : i32
    %c0_i32_1 = arith.constant 0 : i32
    return %c0_i32, %c0_i32_0 : i32, i32
  }
  func.func @transform_2(%arg0: i32) -> (i32, i32) {
    %c0_i32 = arith.constant 0 : i32
    %c0_i32_0 = arith.constant 0 : i32
    %c0_i32_1 = arith.constant 0 : i32
    return %c0_i32, %c0_i32_0 : i32, i32
  }
  func.func @transform_3(%arg0: i32) -> (i32, i32) {
    %c0_i32 = arith.constant 0 : i32
    %c0_i32_0 = arith.constant 0 : i32
    %c0_i32_1 = arith.constant 0 : i32
    return %c0_i32, %c0_i32_0 : i32, i32
  }
  func.func @transform_4(%arg0: i32) -> (i32, i32) {
    %c0_i32 = arith.constant 0 : i32
    %c0_i32_0 = arith.constant 0 : i32
    %c0_i32_1 = arith.constant 0 : i32
    return %c0_i32, %c0_i32_0 : i32, i32
  }
  func.func @transform_5(%arg0: i32) -> (i32, i32) {
    %c0_i32 = arith.constant 0 : i32
    %c0_i32_0 = arith.constant 0 : i32
    %c0_i32_1 = arith.constant 0 : i32
    return %c0_i32, %c0_i32_0 : i32, i32
  }
  func.func @transform_6(%arg0: i32) -> (i32, i32) {
    %c0_i32 = arith.constant 0 : i32
    %c0_i32_0 = arith.constant 0 : i32
    %c0_i32_1 = arith.constant 0 : i32
    return %c0_i32, %c0_i32_0 : i32, i32
  }
  func.func @transform_7(%arg0: i32) -> (i32, i32) {
    %c0_i32 = arith.constant 0 : i32
    %c0_i32_0 = arith.constant 0 : i32
    %c0_i32_1 = arith.constant 0 : i32
    return %c0_i32, %c0_i32_0 : i32, i32
  }
  func.func @transform_8(%arg0: i32) -> (i32, i32) {
    %c0_i32 = arith.constant 0 : i32
    %c0_i32_0 = arith.constant 0 : i32
    %c0_i32_1 = arith.constant 0 : i32
    return %c0_i32, %c0_i32_0 : i32, i32
  }
  func.func @transform_9(%arg0: i32) -> (i32, i32) {
    %c0_i32 = arith.constant 0 : i32
    %c0_i32_0 = arith.constant 0 : i32
    %c0_i32_1 = arith.constant 0 : i32
    return %c0_i32, %c0_i32_0 : i32, i32
  }
  func.func @transform_10(%arg0: i32) -> (i32, i32) {
    %c0_i32 = arith.constant 0 : i32
    %c0_i32_0 = arith.constant 0 : i32
    %c0_i32_1 = arith.constant 0 : i32
    return %c0_i32, %c0_i32_0 : i32, i32
  }
  func.func @transform_11(%arg0: i32) -> (i32, i32) {
    %c0_i32 = arith.constant 0 : i32
    %c0_i32_0 = arith.constant 0 : i32
    %c0_i32_1 = arith.constant 0 : i32
    return %c0_i32, %c0_i32_0 : i32, i32
  }
  func.func @transform_12(%arg0: i32) -> (i32, i32, i32) {
    %c0_i32 = arith.constant 0 : i32
    %c0_i32_0 = arith.constant 0 : i32
    %c0_i32_1 = arith.constant 0 : i32
    return %arg0, %c0_i32, %c0_i32_0 : i32, i32, i32
  }
}

</mosaic_0001>

<bundles_post_ra>
// kernel: tpu_custom_call.1
= control target key start
LH: loop header
LB: loop body
LE: loop exit
PB: predicated region body
PF: predicated region fallthrough
CT: control target
= control target key end

     0   :  { %vm47_vm0 = vcmask 261120   ;;  %s2273_s0 = inlined_call_operand.vmem [shape: f32[2,8,32], index: 0, kind: input, shape index: {}]   ;;  %s2274_s1 = inlined_call_operand.vmem [shape: f32[1,32], index: 1, kind: input, shape index: {}]   ;;  %s2275_s2 = inlined_call_operand.vmem [shape: f32[1,32], index: 2, kind: input, shape index: {}]   ;;  %s2276_s3 = inlined_call_operand.vmem [shape: bf16[32,96], index: 3, kind: input, shape index: {}]   ;;  %s2277_s4 = inlined_call_operand.vmem [shape: bf16[32,32], index: 4, kind: input, shape index: {}]   ;;  %s2278_s5 = inlined_call_operand.vmem [shape: f32[1,32], index: 5, kind: input, shape index: {}]   ;;  %s2279_s6 = inlined_call_operand.vmem [shape: f32[1,32], index: 6, kind: input, shape index: {}]   ;;  %s2280_s7 = inlined_call_operand.vmem [shape: f32[1,32], index: 7, kind: input, shape index: {}]   ;;  %s2281_s8 = inlined_call_operand.vmem [shape: bf16[32,128], index: 8, kind: input, shape index: {}]   ;;  %s2282_s9 = inlined_call_operand.vmem [shape: f32[1,128], index: 9, kind: input, shape index: {}]   ;;  %s2283_s10 = inlined_call_operand.vmem [shape: bf16[128,32], index: 10, kind: input, shape index: {}]   ;;  %s2284_s11 = inlined_call_operand.vmem [shape: f32[1,32], index: 11, kind: input, shape index: {}]   ;;  %s2285_s12 = inlined_call_operand.hbm [shape: f32[2,8,32], index: 12, kind: output, shape index: {}]  }
   0x1   :  { %v2050_v0 = vld [vmem:[%s2273_s0] sm:$0xff] }
   0x2   :  { %v48_v1 = vsel %vm47_vm0, %v2050_v0, 0.0 }
   0x3   :  { %49 = vadd.xlane.f32.xlu0 %v48_v1 }
   0x4   :  { %17 = vsyncpa [#allocation3], 0  ;;  %v2057_v2 = vld [vmem:[%s2273_s0 + $0x8] sm:$0xff]  ;;  %v1978_v4 = vmov 32.0   ;;  %v1822_v23 = vld [vmem:[%s2276_s3] sm:$0xff]  ;;  %vm727_vm8 = vcmask 64512  }
   0x5   :  { %v51_v3 = vsel %vm47_vm0, %v2057_v2, 0.0  ;;  %1910 = vrcp.f32 %v1978_v4  ;;  %v1823_v21 = vld [vmem:[%s2276_s3 + $0x8] sm:$0xff]  ;;  %v1903_v42 = vld [vmem:[%s2274_s1] ss:$0 sm:$0xff]  ;;  %vm1034_vm10 = vcmask 1043456   ;;  %s1735_s18 = sshll.u32 %s2285_s12, 4  ;;  %s1736_s18 = int_to_ptr.hbm [resolvable:$true] %s1735_s18 }
   0x6   :  { %135 = vmatpush.bf16.msra.mxu0 %v1823_v21  ;;  %v1904_v47 = vld [vmem:[%s2275_s2] ss:$0 sm:$0xff]  ;;  %s1981_s19 = smov 8  }
   0xa   :  { %136 = vmatpush.bf16.msra.mxu0 %v1822_v23 }
   0xb   :  { %52 = vadd.xlane.f32.xlu0 %v51_v3  ;;  %v1911_v5 = vpop.eup %1910 }
   0xc   :  { %v55_v6 = vmul.f32 32.0, %v1911_v5  ;;  %vm59_vm1 = vweird.f32 %v1911_v5 }
   0xe   :  { %v56_v7 = vsub.f32 1.0, %v55_v6 }
  0x10   :  { %v57_v8 = vmul.f32 %v1911_v5, %v56_v7 }
  0x12   :  { %v58_v9 = vadd.f32 %v1911_v5, %v57_v8 }
  0x14   :  { %v2061_v10 = vsel %vm59_vm1, %v1911_v5, %v58_v9 }
  0x76   :  { %v50_v11 = vpop.xlane.xlu0 %49 }
  0x77   :  { %v61_v12 = vmul.f32 %v2061_v10, %v50_v11 }
  0x79   :  { %v63_v13 = vsub.f32 %v2050_v0, %v61_v12 }
  0x7b   :  { %v65_v14 = vmul.f32 %v63_v13, %v63_v13 }
  0x7d   :  { %v67_v15 = vsel %vm47_vm0, %v65_v14, 0.0 }
  0x7e   :  { %68 = vadd.xlane.f32.xlu1 %v67_v15  ;;  %v53_v16 = vpop.xlane.xlu0 %52 }
  0x7f   :  { %v62_v17 = vmul.f32 %v2061_v10, %v53_v16 }
  0x81   :  { %v64_v18 = vsub.f32 %v2057_v2, %v62_v17 }
  0x83   :  { %v66_v19 = vmul.f32 %v64_v18, %v64_v18 }
  0x85   :  { %v70_v20 = vsel %vm47_vm0, %v66_v19, 0.0 }
  0x86   :  { %71 = vadd.xlane.f32.xlu1 %v70_v20 }
  0xf1   :  { %v69_v22 = vpop.xlane.xlu1 %68 }
  0xf2   :  { %v73_v24 = vmul.f32 %v69_v22, %v2061_v10 }
  0xf4   :  { %v75_v25 = vadd.f32 1e-05, %v73_v24 }
  0xf6   :  { %1912 = vrsqrt.f32 %v75_v25  ;;  %vm83_vm3 = vweird.f32 %v75_v25 }
  0xf9   :  { %v72_v26 = vpop.xlane.xlu1 %71 }
  0xfa   :  { %v74_v27 = vmul.f32 %v72_v26, %v2061_v10 }
  0xfc   :  { %v1913_v28 = vpop.eup %1912  ;;  %v76_v29 = vadd.f32 1e-05, %v74_v27 }
  0xfd   :  { %v78_v30 = vmul.f32 %v1913_v28, %v75_v25  ;;  %vm84_vm2 = vweird.f32 %v1913_v28 }
  0xfe   :  { %1914 = vrsqrt.f32 %v76_v29  ;;  %vm85_vm4 = vmor %vm83_vm3, %vm84_vm2  ;;  %vm93_vm6 = vweird.f32 %v76_v29 }
  0xff   :  { %v79_v31 = vmul.f32 %v1913_v28, %v78_v30 }
 0x101   :  { %v80_v32 = vmul.f32 0.5, %v79_v31 }
 0x103   :  { %v81_v33 = vsub.f32 1.5, %v80_v32 }
 0x104   :  { %v1915_v34 = vpop.eup %1914 }
 0x105   :  { %v82_v35 = vmul.f32 %v1913_v28, %v81_v33  ;;  %v88_v36 = vmul.f32 %v1915_v34, %v76_v29  ;;  %vm94_vm5 = vweird.f32 %v1915_v34 }
 0x106   :  { %vm95_vm7 = vmor %vm93_vm6, %vm94_vm5 }
 0x107   :  { %v89_v37 = vmul.f32 %v1915_v34, %v88_v36  ;;  %v86_v38 = vsel %vm85_vm4, %v1913_v28, %v82_v35 }
 0x108   :  { %v97_v41 = vmul.f32 %v86_v38, %v63_v13 }
 0x109   :  { %v90_v39 = vmul.f32 0.5, %v89_v37 }
 0x10a   :  { %v102_v46 = vmul.f32 %v1903_v42, %v97_v41 }
 0x10b   :  { %v91_v40 = vsub.f32 1.5, %v90_v39 }
 0x10c   :  { %v107_v49 = vadd.f32 %v1904_v47, %v102_v46 }
 0x10d   :  { %v92_v43 = vmul.f32 %v1915_v34, %v91_v40 }
 0x10f   :  { %v96_v44 = vsel %vm95_vm7, %v1915_v34, %v92_v43  ;;  %v912_v34 = vlaneseq }
 0x110   :  { %v98_v45 = vmul.f32 %v96_v44, %v64_v18 }
 0x111   :  { %v913_v35 = vshrl.u32 %v912_v34, 7  ;;  %v915_v36 = vand.u32 127, %v912_v34 }
 0x112   :  { %v103_v48 = vmul.f32 %v1903_v42, %v98_v45 }
 0x113   :  { %vm2110_vm9 = vcmp.le.s32.totalorder %v915_v36, %v913_v35 }
 0x114   :  { %v108_v50 = vadd.f32 %v1904_v47, %v103_v48 }
 0x116   :  { %v109_v51 = vpack.c.bf16 %v108_v50, %v107_v49 }
 0x118   :  { %1755 = vmatmul.msk.bf16.vlgmr.msra.gmra.mxu0 %vm47_vm0, %v109_v51 }
 0x195   :  { %v138_v52 = vpop.f32.mrf.mxu0 }
 0x196   :  { %143 = vxpose.xlu2.b32.start.end [1/1] (short) (narrow) %v138_v52, 96 }
 0x19d   :  { %v140_v53 = vpop.f32.mrf.mxu0 }
 0x19e   :  { %175 = vxpose.xlu0.b32.start.end [1/1] (short) (narrow) %v140_v53, 96 }
 0x22f   :  { %v159_v54 = vpop.trf.xlu2 }
 0x230   :  { %207 = vxpose.xlu1.b32.start.end [1/1] (short) (narrow) %v159_v54, 8 }
 0x237   :  { %v160_v55 = vpop.trf.xlu2 }
 0x238   :  { %239 = vxpose.xlu0.b32.start.end [1/1] (short) (narrow) %v160_v55, 8 }
 0x23f   :  { %v161_v56 = vpop.trf.xlu2 }
 0x240   :  { %271 = vxpose.xlu2.b32.start.end [1/1] (short) (narrow) %v161_v56, 8 }
 0x242   :  { %v191_v57 = vpop.trf.xlu0 }
 0x243   :  { %335 = vxpose.xlu1.b32.start.end [1/1] (short) (narrow) %v191_v57, 8 }
 0x247   :  { %v162_v58 = vpop.trf.xlu2 }
 0x24a   :  { %v192_v59 = vpop.trf.xlu0 }
 0x24b   :  { %367 = vxpose.xlu1.b32.start.end [1/1] (short) (narrow) %v192_v59, 8 }
 0x24f   :  { %v163_v60 = vpop.trf.xlu2 }
 0x250   :  { %746 = vmatpush.msra.mxu1 %v163_v60 }
 0x252   :  { %v193_v61 = vpop.trf.xlu0 }
 0x253   :  { %303 = vxpose.xlu1.b32.start.end [1/1] (short) (narrow) %v162_v58, 8  ;;  %399 = vxpose.xlu2.b32.start.end [1/1] (short) (narrow) %v193_v61, 8 }
 0x257   :  { %v164_v62 = vpop.trf.xlu2 }
 0x258   :  { %769 = vmatpush.msra.mxu2 %v164_v62 }
 0x25a   :  { %v194_v63 = vpop.trf.xlu0 }
 0x25b   :  { %431 = vxpose.xlu1.b32.start.end [1/1] (short) (narrow) %v194_v63, 8 }
 0x25f   :  { %v165_v1 = vpop.trf.xlu2 }
 0x260   :  { %792 = vmatpush.msra.mxu3 %v165_v1 }
 0x262   :  { %v195_v3 = vpop.trf.xlu0 }
 0x263   :  { %838 = vmatpush.msrb.mxu2 %v195_v3 }
 0x267   :  { %v166_v4 = vpop.trf.xlu2 }
 0x268   :  { %815 = vmatpush.msrb.mxu1 %v166_v4 }
 0x26a   :  { %v196_v5 = vpop.trf.xlu0 }
 0x26b   :  { %861 = vmatpush.msrb.mxu3 %v196_v5 }
 0x26f   :  { %v2084_v6 = vpop.trf.xlu2 }
 0x272   :  { %v197_v11 = vpop.trf.xlu0 }
 0x277   :  { %v2086_v7 = vpop.trf.xlu2 }
 0x27a   :  { %v198_v12 = vpop.trf.xlu0 }
 0x27f   :  { %v2088_v8 = vpop.trf.xlu2 }
 0x280   :  { %v1841_v9 = vpack.i.bf16 %v2084_v6, %v2088_v8 }
 0x282   :  { %v2092_v13 = vpop.trf.xlu0 }
 0x287   :  { %v2098_v16 = vpop.trf.xlu2 }
 0x288   :  { %v1848_v62 = vpack.i.bf16 %v2098_v16, %v2086_v7 }
 0x28a   :  { %v2094_v14 = vpop.trf.xlu0 }
 0x292   :  { %v2096_v15 = vpop.trf.xlu0 }
 0x29a   :  { %v2100_v17 = vpop.trf.xlu0 }
 0x2d4   :  { %v223_v18 = vpop.trf.xlu1 }
 0x2d5   :  { %v463_v19 = vmul.f32 0.35355338, %v223_v18 }
 0x2d7   :  { %1756 = vmatmul.msk.f32.vlgmr.msra.gmra.mxu1 %vm727_vm8, %v463_v19 }
 0x2d8   :  { %884 = vmatpush.msra.mxu1 %v197_v11 }
 0x2d9   :  { %v287_v20 = vpop.trf.xlu2 }
 0x2da   :  { %v465_v21 = vmul.f32 0.35355338, %v287_v20 }
 0x2dc   :  { %1758 = vmatmul.msk.f32.vlgmr.msra.gmra.mxu3 %vm727_vm8, %v465_v21  ;;  %v255_v22 = vpop.trf.xlu0 }
 0x2dd   :  { %v464_v23 = vmul.f32 0.35355338, %v255_v22 }
 0x2df   :  { %1757 = vmatmul.msk.f32.vlgmr.msra.gmra.mxu2 %vm727_vm8, %v464_v23 }
 0x2e0   :  { %907 = vmatpush.msra.mxu2 %v198_v12 }
 0x2e7   :  { %v351_v24 = vpop.trf.xlu1 }
 0x2e8   :  { %v467_v25 = vmul.f32 0.35355338, %v351_v24 }
 0x2ea   :  { %1760 = vmatmul.msk.f32.vlgmr.msrb.gmra.mxu2 %vm727_vm8, %v467_v25 }
 0x2ec   :  { %v415_v30 = vpop.trf.xlu2 }
 0x2ed   :  { %v469_v31 = vmul.f32 0.35355338, %v415_v30 }
 0x2ef   :  { %v383_v26 = vpop.trf.xlu1 }
 0x2f0   :  { %v468_v27 = vmul.f32 0.35355338, %v383_v26 }
 0x2f2   :  { %1761 = vmatmul.msk.f32.vlgmr.msrb.gmra.mxu3 %vm727_vm8, %v468_v27 }
 0x2f7   :  { %v319_v28 = vpop.trf.xlu1 }
 0x2f8   :  { %v466_v29 = vmul.f32 0.35355338, %v319_v28 }
 0x2fa   :  { %1759 = vmatmul.msk.f32.vlgmr.msrb.gmra.mxu1 %vm727_vm8, %v466_v29 }
 0x2ff   :  { %v447_v32 = vpop.trf.xlu1 }
 0x300   :  { %v470_v33 = vmul.f32 0.35355338, %v447_v32 }
 0x302   :  { %1763 = vmatmul.msk.f32.vlgmr.msra.gmra.mxu2 %vm727_vm8, %v470_v33  ;;  %1762 = vmatmul.msk.f32.vlgmr.msra.gmra.mxu1 %vm727_vm8, %v469_v31 }
 0x354   :  { %v748_v38 = vpop.f32.mrf.mxu1 }
 0x355   :  { %v919_v39 = vsel %vm2110_vm9, %v748_v38, -1e+30 }
 0x356   :  { %v927_v40 = vsel %vm727_vm8, %v919_v39, -inf }
 0x357   :  { %928 = vmax.xlane.f32.xlu2 %v927_v40 }
 0x35f   :  { %v794_v41 = vpop.f32.mrf.mxu3 }
 0x360   :  { %v921_v42 = vsel %vm2110_vm9, %v794_v41, -1e+30 }
 0x361   :  { %v933_v43 = vsel %vm727_vm8, %v921_v42, -inf }
 0x362   :  { %934 = vmax.xlane.f32.xlu1 %v933_v43  ;;  %v771_v44 = vpop.f32.mrf.mxu2 }
 0x363   :  { %v920_v45 = vsel %vm2110_vm9, %v771_v44, -1e+30 }
 0x364   :  { %v930_v46 = vsel %vm727_vm8, %v920_v45, -inf }
 0x365   :  { %931 = vmax.xlane.f32.xlu0 %v930_v46  ;;  %v1855_v46 = vpack.i.bf16 %v2100_v17, %v2094_v14 }
 0x36d   :  { %v840_v47 = vpop.f32.mrf.mxu2 }
 0x36e   :  { %v923_v48 = vsel %vm2110_vm9, %v840_v47, -1e+30 }
 0x36f   :  { %v939_v49 = vsel %vm727_vm8, %v923_v48, -inf }
 0x370   :  { %940 = vmax.xlane.f32.xlu1 %v939_v49 }
 0x375   :  { %v863_v53 = vpop.f32.mrf.mxu3 }
 0x376   :  { %v924_v54 = vsel %vm2110_vm9, %v863_v53, -1e+30 }
 0x377   :  { %v817_v50 = vpop.f32.mrf.mxu1  ;;  %v942_v55 = vsel %vm727_vm8, %v924_v54, -inf }
 0x378   :  { %v922_v51 = vsel %vm2110_vm9, %v817_v50, -1e+30 }
 0x379   :  { %v936_v52 = vsel %vm727_vm8, %v922_v51, -inf }
 0x37a   :  { %937 = vmax.xlane.f32.xlu1 %v936_v52 }
 0x37f   :  { %v886_v56 = vpop.f32.mrf.mxu1 }
 0x380   :  { %v925_v57 = vsel %vm2110_vm9, %v886_v56, -1e+30 }
 0x381   :  { %v945_v61 = vsel %vm727_vm8, %v925_v57, -inf }
 0x382   :  { %943 = vmax.xlane.f32.xlu1 %v942_v55 }
 0x385   :  { %v909_v58 = vpop.f32.mrf.mxu2 }
 0x386   :  { %v926_v59 = vsel %vm2110_vm9, %v909_v58, -1e+30 }
 0x387   :  { %v948_v60 = vsel %vm727_vm8, %v926_v59, -inf }
 0x388   :  { %949 = vmax.xlane.f32.xlu2 %v948_v60 }
 0x38a   :  { %946 = vmax.xlane.f32.xlu1 %v945_v61 }
 0x3b1   :  { %1849 = vxpose.xlu2.b32.start.end [1/1] (short) (narrow) %v1848_v62, 8 }
 0x3c4   :  { %1842 = vxpose.xlu1.b32.start.end [1/1] (short) (narrow) %v1841_v9, 8 }
 0x3ca   :  { %v929_v16 = vpop.xlane.xlu2 %928 }
 0x3cb   :  { %v951_v21 = vsub.f32 %v919_v39, %v929_v16 }
 0x3cd   :  { %v959_v8 = vmul.f32 1.442695, %v951_v21 }
 0x3d5   :  { %v935_v63 = vpop.xlane.xlu1 %934 }
 0x3d6   :  { %v953_v9 = vsub.f32 %v921_v42, %v935_v63 }
 0x3d8   :  { %v932_v7 = vpop.xlane.xlu0 %931  ;;  %v963_v23 = vmul.f32 1.442695, %v953_v9 }
 0x3d9   :  { %v952_v20 = vsub.f32 %v920_v45, %v932_v7 }
 0x3db   :  { %v961_v6 = vmul.f32 1.442695, %v952_v20 }
 0x3e3   :  { %v941_v1 = vpop.xlane.xlu1 %940 }
 0x3e4   :  { %v955_v27 = vsub.f32 %v923_v48, %v941_v1 }
 0x3e6   :  { %v967_v30 = vmul.f32 1.442695, %v955_v27 }
 0x3ed   :  { %v938_v3 = vpop.xlane.xlu1 %937 }
 0x3ee   :  { %v954_v22 = vsub.f32 %v922_v51, %v938_v3 }
 0x3f0   :  { %v965_v25 = vmul.f32 1.442695, %v954_v22 }
 0x3f5   :  { %v944_v4 = vpop.xlane.xlu1 %943 }
 0x3f6   :  { %v956_v33 = vsub.f32 %v924_v54, %v944_v4 }
 0x3f8   :  { %v969_v36 = vmul.f32 1.442695, %v956_v33 }
 0x3fb   :  { %v950_v37 = vpop.xlane.xlu2 %949 }
 0x3fc   :  { %v958_v39 = vsub.f32 %v926_v59, %v950_v37 }
 0x3fd   :  { %v947_v5 = vpop.xlane.xlu1 %946 }
 0x3fe   :  { %v957_v11 = vsub.f32 %v925_v57, %v947_v5  ;;  %v973_v41 = vmul.f32 1.442695, %v958_v39 }
 0x400   :  { %v971_v12 = vmul.f32 1.442695, %v957_v11 }
 0x402   :  { %1916 = vpow2.f32 %v971_v12 }
 0x403   :  { %1918 = vpow2.f32 %v961_v6 }
 0x404   :  { %1920 = vpow2.f32 %v959_v8 }
 0x405   :  { %1922 = vpow2.f32 %v963_v23 }
 0x406   :  { %1924 = vpow2.f32 %v965_v25 }
 0x407   :  { %1926 = vpow2.f32 %v967_v30 }
 0x408   :  { %v2143_v18 = vpop.eup %1916  ;;  %1928 = vpow2.f32 %v969_v36 }
 0x409   :  { %v993_v19 = vsel %vm727_vm8, %v2143_v18, 0.0  ;;  %v1919_v24 = vpop.eup %1918  ;;  %1930 = vpow2.f32 %v973_v41 }
 0x40a   :  { %994 = vadd.xlane.f32.xlu0 %v993_v19  ;;  %v2147_v26 = vpop.eup %1920  ;;  %v978_v28 = vsel %vm727_vm8, %v1919_v24, 0.0 }
 0x40b   :  { %v975_v29 = vsel %vm727_vm8, %v2147_v26, 0.0  ;;  %v1923_v31 = vpop.eup %1922 }
 0x40c   :  { %v2152_v32 = vpop.eup %1924  ;;  %v981_v34 = vsel %vm727_vm8, %v1923_v31, 0.0 }
 0x40d   :  { %v984_v35 = vsel %vm727_vm8, %v2152_v32, 0.0  ;;  %v2157_v38 = vpop.eup %1926 }
 0x40e   :  { %v987_v40 = vsel %vm727_vm8, %v2157_v38, 0.0  ;;  %v2162_v42 = vpop.eup %1928 }
 0x40f   :  { %v990_v43 = vsel %vm727_vm8, %v2162_v42, 0.0  ;;  %v2166_v44 = vpop.eup %1930 }
 0x410   :  { %v996_v45 = vsel %vm727_vm8, %v2166_v44, 0.0 }
 0x422   :  { %979 = vadd.xlane.f32.xlu2 %v978_v28 }
 0x424   :  { %976 = vadd.xlane.f32.xlu1 %v975_v29 }
 0x42a   :  { %982 = vadd.xlane.f32.xlu2 %v981_v34 }
 0x42c   :  { %985 = vadd.xlane.f32.xlu1 %v984_v35 }
 0x432   :  { %988 = vadd.xlane.f32.xlu2 %v987_v40 }
 0x433   :  { %599 = vxpose.xlu0.b32.start.end [1/1] (short) (narrow) %v2092_v13, 8 }
 0x43a   :  { %991 = vadd.xlane.f32.xlu2 %v990_v43 }
 0x442   :  { %997 = vadd.xlane.f32.xlu2 %v996_v45 }
 0x44a   :  { %v1850_v47 = vpop.trf.xlu2 }
 0x44b   :  { %v1851_v49 = vunpack.i.l.bf16 %v1850_v47  ;;  %v1854_v17 = vunpack.i.h.bf16 %v1850_v47 }
 0x44d   :  { %v1024_v50 = vpack.c.bf16 %v1851_v49, %v1851_v49  ;;  %v1026_v56 = vpack.c.bf16 %v1854_v17, %v1854_v17 }
 0x44f   :  { %v1055_v51 = vsel %vm1034_vm10, %v1024_v50, 0 }
 0x450   :  { %1064 = vmatpush.bf16.msrb.mxu0 %v1055_v51 }
 0x466   :  { %1856 = vxpose.xlu1.b32.start.end [1/1] (short) (narrow) %v1855_v46, 8 }
 0x468   :  { %v1843_v13 = vpop.trf.xlu1 }
 0x469   :  { %v1847_v48 = vunpack.i.h.bf16 %v1843_v13  ;;  %v1844_v53 = vunpack.i.l.bf16 %v1843_v13 }
 0x46b   :  { %663 = vxpose.xlu2.b32.start.end [1/1] (short) (narrow) %v2096_v15, 8  ;;  %v1023_v52 = vpack.c.bf16 %v1847_v48, %v1847_v48  ;;  %v1025_v55 = vpack.c.bf16 %v1844_v53, %v1844_v53  ;;  %v1093_v15 = vsel %vm1034_vm10, %v1026_v56, 0 }
 0x46d   :  { %v1036_v54 = vsel %vm1034_vm10, %v1023_v52, 0  ;;  %v1074_v14 = vsel %vm1034_vm10, %v1025_v55, 0 }
 0x46e   :  { %1045 = vmatpush.bf16.msra.mxu3 %v1036_v54  ;;  %1083 = vmatpush.bf16.msrb.mxu2 %v1074_v14 }
 0x472   :  { %1102 = vmatpush.bf16.msra.mxu2 %v1093_v15 }
 0x47d   :  { %v995_v21 = vpop.xlane.xlu0 %994 }
 0x495   :  { %v980_v57 = vpop.xlane.xlu2 %979 }
 0x496   :  { %1932 = vrcp.f32 %v980_v57 }
 0x497   :  { %v977_v58 = vpop.xlane.xlu1 %976 }
 0x498   :  { %1934 = vrcp.f32 %v977_v58 }
 0x49c   :  { %v1933_v59 = vpop.eup %1932 }
 0x49d   :  { %v1008_v60 = vmul.f32 %v1933_v59, %v1919_v24  ;;  %v983_v61 = vpop.xlane.xlu2 %982 }
 0x49e   :  { %v1935_v62 = vpop.eup %1934  ;;  %1936 = vrcp.f32 %v983_v61 }
 0x49f   :  { %v1007_v63 = vmul.f32 %v1935_v62, %v2147_v26  ;;  %v1016_v1 = vpack.c.bf16 %v1008_v60, %v1008_v60  ;;  %v986_v12 = vpop.xlane.xlu1 %985 }
 0x4a0   :  { %1938 = vrcp.f32 %v986_v12 }
 0x4a1   :  { %v1015_v3 = vpack.c.bf16 %v1007_v63, %v1007_v63  ;;  %1765 = vmatmul.msk.bf16.vlgmr.msrb.gmra.mxu0 %vm727_vm8, %v1016_v1  ;;  %v1825_v63 = vld [vmem:[%s2277_s4 + $0x8] sm:$0xff] }
 0x4a3   :  { %1764 = vmatmul.msk.bf16.vlgmr.msra.gmra.mxu3 %vm727_vm8, %v1015_v3 }
 0x4a4   :  { %v1937_v4 = vpop.eup %1936 }
 0x4a5   :  { %v1009_v5 = vmul.f32 %v1937_v4, %v1923_v31  ;;  %v989_v20 = vpop.xlane.xlu2 %988  ;;  %v1824_v4 = vld [vmem:[%s2277_s4] sm:$0xff] }
 0x4a6   :  { %v1939_v19 = vpop.eup %1938  ;;  %1940 = vrcp.f32 %v989_v20 }
 0x4a7   :  { %v1017_v11 = vpack.c.bf16 %v1009_v5, %v1009_v5  ;;  %v1010_v7 = vmul.f32 %v1939_v19, %v2152_v32  ;;  %1942 = vrcp.f32 %v995_v21 }
 0x4a9   :  { %1766 = vmatmul.msk.bf16.vlgmr.msrb.gmra.mxu2 %vm727_vm8, %v1017_v11  ;;  %v1018_v16 = vpack.c.bf16 %v1010_v7, %v1010_v7  ;;  %v1905_v7 = vld [vmem:[%s2278_s5] ss:$0 sm:$0xff] }
 0x4ac   :  { %v1941_v6 = vpop.eup %1940 }
 0x4ad   :  { %v1011_v9 = vmul.f32 %v1941_v6, %v2157_v38  ;;  %v992_v25 = vpop.xlane.xlu2 %991  ;;  %v1943_v27 = vpop.eup %1942 }
 0x4ae   :  { %1944 = vrcp.f32 %v992_v25  ;;  %v1013_v29 = vmul.f32 %v1943_v27, %v2143_v18 }
 0x4af   :  { %v1019_v24 = vpack.c.bf16 %v1011_v9, %v1011_v9 }
 0x4b0   :  { %v1021_v33 = vpack.c.bf16 %v1013_v29, %v1013_v29 }
 0x4b4   :  { %v1945_v32 = vpop.eup %1944 }
 0x4b5   :  { %v998_v26 = vpop.xlane.xlu2 %997  ;;  %v1012_v38 = vmul.f32 %v1945_v32, %v2162_v42  ;;  %v1827_v32 = vld [vmem:[%s2281_s8 + $0x8] sm:$0xff] }
 0x4b6   :  { %1946 = vrcp.f32 %v998_v26 }
 0x4b7   :  { %v1020_v45 = vpack.c.bf16 %v1012_v38, %v1012_v38 }
 0x4b9   :  { %1767 = vmatmul.msk.bf16.vlgmr.msra.gmra.mxu2 %vm727_vm8, %v1018_v16 }
 0x4bc   :  { %v1947_v34 = vpop.eup %1946 }
 0x4bd   :  { %v1014_v39 = vmul.f32 %v1947_v34, %v2166_v44 }
 0x4bf   :  { %v1022_v46 = vpack.c.bf16 %v1014_v39, %v1014_v39 }
 0x4d7   :  { %v615_v8 = vpop.trf.xlu0 }
 0x4d8   :  { %v1027_v22 = vpack.c.bf16 %v615_v8, %v615_v8 }
 0x4da   :  { %v1112_v23 = vsel %vm1034_vm10, %v1027_v22, 0 }
 0x4db   :  { %1121 = vmatpush.bf16.msrb.mxu3 %v1112_v23 }
 0x4de   :  { %1768 = vmatmul.msk.bf16.vlgmr.msrb.gmra.mxu3 %vm727_vm8, %v1019_v24 }
 0x4df   :  { %1530 = vmatpush.bf16.msra.mxu3 %v1825_v63  ;;  %v1829_v63 = vld [vmem:[%s2283_s10 + $0x8] sm:$0xff] }
 0x4e3   :  { %1531 = vmatpush.bf16.msra.mxu3 %v1824_v4  ;;  %v1908_v4 = vld [vmem:[%s2282_s9] ss:$0 sm:$0xff] }
 0x504   :  { %v679_v28 = vpop.trf.xlu2 }
 0x505   :  { %v1029_v30 = vpack.c.bf16 %v679_v28, %v679_v28 }
 0x507   :  { %v1150_v31 = vsel %vm1034_vm10, %v1029_v30, 0 }
 0x508   :  { %1159 = vmatpush.bf16.msrb.mxu1 %v1150_v31 }
 0x50a   :  { %v1857_v35 = vpop.trf.xlu1 }
 0x50b   :  { %v1861_v36 = vunpack.i.h.bf16 %v1857_v35  ;;  %v1858_v37 = vunpack.i.l.bf16 %v1857_v35  ;;  %1770 = vmatmul.msk.bf16.vlgmr.msrb.gmra.mxu1 %vm727_vm8, %v1021_v33 }
 0x50d   :  { %v1028_v40 = vpack.c.bf16 %v1858_v37, %v1858_v37  ;;  %v1030_v41 = vpack.c.bf16 %v1861_v36, %v1861_v36  ;;  %v1826_v36 = vld [vmem:[%s2281_s8] sm:$0xff]  ;;  %v1835_v37 = vld [vmem:[%s2283_s10 + $0x38] sm:$0xff] }
 0x50e   :  { %1711 = vmatpush.bf16.msra.mxu1 %v1835_v37 }
 0x50f   :  { %v1131_v18 = vsel %vm1034_vm10, %v1028_v40, 0  ;;  %v1169_v43 = vsel %vm1034_vm10, %v1030_v41, 0  ;;  %v1834_v40 = vld [vmem:[%s2283_s10 + $0x30] sm:$0xff] }
 0x510   :  { %1140 = vmatpush.bf16.msra.mxu0 %v1131_v18  ;;  %1178 = vmatpush.bf16.msrb.mxu2 %v1169_v43 }
 0x512   :  { %1712 = vmatpush.bf16.msra.mxu1 %v1834_v40 }
 0x513   :  { %1769 = vmatmul.msk.bf16.vlgmr.msra.gmra.mxu0 %vm727_vm8, %v1020_v45  ;;  %1771 = vmatmul.msk.bf16.vlgmr.msrb.gmra.mxu2 %vm727_vm8, %v1022_v46  ;;  %v1833_v45 = vld [vmem:[%s2283_s10 + $0x28] sm:$0xff] }
 0x514   :  { %1632 = vmatpush.bf16.msrb.mxu0 %v1827_v32 }
 0x516   :  { %1713 = vmatpush.bf16.msra.mxu1 %v1833_v45 }
 0x518   :  { %1633 = vmatpush.bf16.msrb.mxu0 %v1826_v36 }
 0x51e   :  { %v1066_v47 = vpop.f32.mrf.mxu0 }
 0x526   :  { %v1047_v13 = vpop.f32.mrf.mxu3  ;;  %v1068_v48 = vpop.f32.mrf.mxu0 }
 0x52c   :  { %v1085_v42 = vpop.f32.mrf.mxu2 }
 0x52e   :  { %v1049_v49 = vpop.f32.mrf.mxu3 }
 0x534   :  { %v1087_v44 = vpop.f32.mrf.mxu2 }
 0x53c   :  { %v1104_v50 = vpop.f32.mrf.mxu2 }
 0x544   :  { %v1106_v51 = vpop.f32.mrf.mxu2 }
 0x561   :  { %v1123_v52 = vpop.f32.mrf.mxu3 }
 0x562   :  { %v1862_v53 = vpack.i.bf16 %v1123_v52, %v1047_v13 }
 0x564   :  { %1863 = vxpose.xlu0.b32.start.end [1/1] (short) (narrow) %v1862_v53, 8  ;;  %v1906_v53 = vld [vmem:[%s2279_s6] ss:$0 sm:$0xff] }
 0x569   :  { %v1125_v54 = vpop.f32.mrf.mxu3 }
 0x588   :  { %v1161_v55 = vpop.f32.mrf.mxu1 }
 0x589   :  { %v1876_v14 = vpack.i.bf16 %v1161_v55, %v1085_v42 }
 0x58b   :  { %1877 = vxpose.xlu2.b32.start.end [1/1] (short) (narrow) %v1876_v14, 8 }
 0x590   :  { %v1142_v17 = vpop.f32.mrf.mxu0  ;;  %v1163_v56 = vpop.f32.mrf.mxu1 }
 0x591   :  { %v1869_v57 = vpack.i.bf16 %v1142_v17, %v1066_v47  ;;  %v1907_v17 = vld [vmem:[%s2280_s7] ss:$0 sm:$0xff] }
 0x593   :  { %1870 = vxpose.xlu1.b32.start.end [1/1] (short) (narrow) %v1869_v57, 8 }
 0x596   :  { %v1180_v15 = vpop.f32.mrf.mxu2 }
 0x597   :  { %v1883_v58 = vpack.i.bf16 %v1180_v15, %v1104_v50 }
 0x598   :  { %v1144_v59 = vpop.f32.mrf.mxu0 }
 0x599   :  { %1884 = vxpose.xlu0.b32.start.end [1/1] (short) (narrow) %v1883_v58, 8 }
 0x59e   :  { %v1182_v60 = vpop.f32.mrf.mxu2 }
 0x608   :  { %v1864_v61 = vpop.trf.xlu0 }
 0x609   :  { %1891 = vxpose.xlu1.b32.start [1/4] (short) (narrow) %v1864_v61, 8  ;;  %v1831_v61 = vld [vmem:[%s2283_s10 + $0x18] sm:$0xff] }
 0x624   :  { %v1878_v62 = vpop.trf.xlu2 }
 0x637   :  { %v1871_v1 = vpop.trf.xlu1 }
 0x638   :  { %1893 = vxpose.xlu1.b32.cont [2/4] (short) (narrow) %v1871_v1, 8  ;;  %v1828_v1 = vld [vmem:[%s2283_s10] sm:$0xff] }
 0x63d   :  { %v1885_v3 = vpop.trf.xlu0 }
 0x640   :  { %1895 = vxpose.xlu1.b32.cont [3/4] (short) (narrow) %v1878_v62, 8  ;;  %v1830_v62 = vld [vmem:[%s2283_s10 + $0x10] sm:$0xff] }
 0x648   :  { %1897 = vxpose.xlu1.b32.end [4/4] (short) (narrow) %v1885_v3, 8 }
 0x6d4   :  { %v1898_v5 = vpop.trf.xlu1 }
 0x6d5   :  { %v1902_v11 = vunpack.i.h.bf16 %v1898_v5  ;;  %v1899_v12 = vunpack.i.l.bf16 %v1898_v5 }
 0x6d7   :  { %v1504_v19 = vpack.c.bf16 %v1902_v11, %v1899_v12 }
 0x6d9   :  { %1780 = vmatmul.msk.bf16.vlgmr.msra.gmra.mxu3 %vm47_vm0, %v1504_v19 }
 0x75c   :  { %v1533_v16 = vpop.f32.mrf.mxu3 }
 0x75d   :  { %v1538_v20 = vadd.f32 %v1533_v16, %v2050_v0 }
 0x75f   :  { %v2206_v21 = vadd.f32 %v1905_v7, %v1538_v20  ;;  %v1909_v20 = vld [vmem:[%s2284_s11] ss:$0 sm:$0xff]  ;;  %s1980_s11 = smov 128  }
 0x761   :  { %v1548_v6 = vsel %vm47_vm0, %v2206_v21, 0.0 }
 0x762   :  { %1549 = vadd.xlane.f32.xlu2 %v1548_v6 }
 0x764   :  { %v1535_v8 = vpop.f32.mrf.mxu3 }
 0x765   :  { %v1539_v9 = vadd.f32 %v1535_v8, %v2057_v2 }
 0x767   :  { %v2211_v22 = vadd.f32 %v1905_v7, %v1539_v9 }
 0x769   :  { %v1551_v23 = vsel %vm47_vm0, %v2211_v22, 0.0 }
 0x76a   :  { %1552 = vadd.xlane.f32.xlu0 %v1551_v23 }
 0x7d5   :  { %v1550_v24 = vpop.xlane.xlu2 %1549 }
 0x7d6   :  { %v1554_v25 = vmul.f32 %v1550_v24, %v2061_v10 }
 0x7d8   :  { %v1556_v0 = vsub.f32 %v2206_v21, %v1554_v25 }
 0x7da   :  { %v1558_v26 = vmul.f32 %v1556_v0, %v1556_v0 }
 0x7dc   :  { %v1560_v27 = vsel %vm47_vm0, %v1558_v26, 0.0 }
 0x7dd   :  { %1561 = vadd.xlane.f32.xlu1 %v1560_v27  ;;  %v1553_v28 = vpop.xlane.xlu0 %1552 }
 0x7de   :  { %v1555_v29 = vmul.f32 %v1553_v28, %v2061_v10 }
 0x7e0   :  { %v1557_v2 = vsub.f32 %v2211_v22, %v1555_v29 }
 0x7e2   :  { %v1559_v30 = vmul.f32 %v1557_v2, %v1557_v2 }
 0x7e4   :  { %v1563_v31 = vsel %vm47_vm0, %v1559_v30, 0.0 }
 0x7e5   :  { %1564 = vadd.xlane.f32.xlu2 %v1563_v31 }
 0x850   :  { %v1562_v33 = vpop.xlane.xlu1 %1561 }
 0x851   :  { %v1566_v34 = vmul.f32 %v1562_v33, %v2061_v10 }
 0x853   :  { %v1568_v35 = vadd.f32 1e-05, %v1566_v34 }
 0x855   :  { %1948 = vrsqrt.f32 %v1568_v35  ;;  %vm1576_vm12 = vweird.f32 %v1568_v35 }
 0x858   :  { %v1565_v38 = vpop.xlane.xlu2 %1564 }
 0x859   :  { %v1567_v39 = vmul.f32 %v1565_v38, %v2061_v10  ;;  %v1832_v10 = vld [vmem:[%s2283_s10 + $0x20] sm:$0xff]  ;;  %s1979_s10 = smov [#allocation2]  }
 0x85a   :  { %1714 = vmatpush.bf16.msra.mxu1 %v1832_v10  ;;  %s1733_s5 = sshll.u32 %s1979_s10, 4  ;;  %s1734_s5 = int_to_ptr.vmem [resolvable:$true] %s1733_s5 }
 0x85b   :  { %v1949_v41 = vpop.eup %1948  ;;  %v1569_v18 = vadd.f32 1e-05, %v1567_v39 }
 0x85c   :  { %v1571_v43 = vmul.f32 %v1949_v41, %v1568_v35  ;;  %vm1577_vm11 = vweird.f32 %v1949_v41 }
 0x85d   :  { %1950 = vrsqrt.f32 %v1569_v18  ;;  %vm1578_vm13 = vmor %vm1576_vm12, %vm1577_vm11  ;;  %vm1586_vm15 = vweird.f32 %v1569_v18 }
 0x85e   :  { %v1572_v46 = vmul.f32 %v1949_v41, %v1571_v43  ;;  %1715 = vmatpush.bf16.msra.mxu1 %v1831_v61 }
 0x860   :  { %v1573_v47 = vmul.f32 0.5, %v1572_v46 }
 0x862   :  { %v1574_v13 = vsub.f32 1.5, %v1573_v47  ;;  %1716 = vmatpush.bf16.msra.mxu1 %v1830_v62 }
 0x863   :  { %v1951_v48 = vpop.eup %1950 }
 0x864   :  { %v1575_v42 = vmul.f32 %v1949_v41, %v1574_v13  ;;  %v1581_v49 = vmul.f32 %v1951_v48, %v1569_v18  ;;  %vm1587_vm14 = vweird.f32 %v1951_v48 }
 0x865   :  { %vm1588_vm1 = vmor %vm1586_vm15, %vm1587_vm14 }
 0x866   :  { %v1582_v44 = vmul.f32 %v1951_v48, %v1581_v49  ;;  %v1579_v50 = vsel %vm1578_vm13, %v1949_v41, %v1575_v42  ;;  %1717 = vmatpush.bf16.msra.mxu1 %v1829_v63 }
 0x867   :  { %v1590_v54 = vmul.f32 %v1579_v50, %v1556_v0 }
 0x868   :  { %v1583_v51 = vmul.f32 0.5, %v1582_v44 }
 0x869   :  { %v1595_v56 = vmul.f32 %v1906_v53, %v1590_v54 }
 0x86a   :  { %v1584_v52 = vsub.f32 1.5, %v1583_v51  ;;  %1718 = vmatpush.bf16.msra.mxu1 %v1828_v1 }
 0x86b   :  { %v1600_v58 = vadd.f32 %v1907_v17, %v1595_v56 }
 0x86c   :  { %v1585_v55 = vmul.f32 %v1951_v48, %v1584_v52 }
 0x86e   :  { %v1589_v14 = vsel %vm1588_vm1, %v1951_v48, %v1585_v55 }
 0x86f   :  { %v1591_v57 = vmul.f32 %v1589_v14, %v1557_v2 }
 0x871   :  { %v1596_v15 = vmul.f32 %v1906_v53, %v1591_v57 }
 0x873   :  { %v1601_v59 = vadd.f32 %v1907_v17, %v1596_v15 }
 0x875   :  { %v1602_v60 = vpack.c.bf16 %v1601_v59, %v1600_v58 }
 0x877   :  { %1789 = vmatmul.msk.bf16.vlgmr.msrb.gmra.mxu0 %vm47_vm0, %v1602_v60 }
 0x8f4   :  { %v1635_v3 = vpop.f32.mrf.mxu0 }
 0x8f5   :  { %v1636_v5 = vadd.f32 %v1908_v4, %v1635_v3 }
 0x8f7   :  { %v1640_v19 = vmax.f32 %v1636_v5, 0.0 }
 0x8fc   :  { %v1637_v11 = vpop.f32.mrf.mxu0 }
 0x8fd   :  { %v1638_v12 = vadd.f32 %v1908_v4, %v1637_v11 }
 0x8ff   :  { %v1641_v7 = vmax.f32 %v1638_v12, 0.0 }
 0x901   :  { %v1642_v16 = vpack.c.bf16 %v1641_v7, %v1640_v19 }
 0x903   :  { %1719 = vmatmul.bf16.vlgmr.msra.gmra.mxu1 %v1642_v16 }
 0x980   :  { %v1720_v6 = vpop.f32.mrf.mxu1 }
 0x981   :  { %v1721_v8 = vadd.f32 %v1909_v20, %v1720_v6 }
 0x983   :  { %v1725_v9 = vadd.f32 %v1721_v8, %v2206_v21 }
 0x985   :  { %1727 = vst.msk [vmem:[#allocation2] sm:$0xff] %vm47_vm0, %v1725_v9 }
 0x988   :  { %v1722_v23 = vpop.f32.mrf.mxu1 }
 0x989   :  { %v1723_v24 = vadd.f32 %v1909_v20, %v1722_v23 }
 0x98b   :  { %v1726_v25 = vadd.f32 %v1723_v24, %v2211_v22 }
 0x98d   :  { %1728 = vst.msk [vmem:[#allocation2 + $0x8] sm:$0xff] %vm47_vm0, %v1726_v25 }
 0x98e   :  { %1741 = dma.vmem_to_hbm [thread:$0]  %s1734_s5, 256, %s1736_s18, [#allocation3], %s1980_s11, %s1980_s11, %s1981_s19  }
 0x98f   :  { %1976 = dma.done.wait [#allocation3], 256  }
 0x990   :  { %1977 = vsyncadd [#allocation3], 4294967040 }
 0x991   :  { %1746 = vsyncpa [#allocation3], 1 }

// kernel: tpu_custom_call.1
= control target key start
LH: loop header
LB: loop body
LE: loop exit
PB: predicated region body
PF: predicated region fallthrough
CT: control target
= control target key end

     0   :  { %vm47_vm0 = vcmask 261120   ;;  %s2273_s0 = inlined_call_operand.vmem [shape: f32[2,8,32], index: 0, kind: input, shape index: {}]   ;;  %s2274_s1 = inlined_call_operand.vmem [shape: f32[1,32], index: 1, kind: input, shape index: {}]   ;;  %s2275_s2 = inlined_call_operand.vmem [shape: f32[1,32], index: 2, kind: input, shape index: {}]   ;;  %s2276_s3 = inlined_call_operand.vmem [shape: bf16[32,96], index: 3, kind: input, shape index: {}]   ;;  %s2277_s4 = inlined_call_operand.vmem [shape: bf16[32,32], index: 4, kind: input, shape index: {}]   ;;  %s2278_s5 = inlined_call_operand.vmem [shape: f32[1,32], index: 5, kind: input, shape index: {}]   ;;  %s2279_s6 = inlined_call_operand.vmem [shape: f32[1,32], index: 6, kind: input, shape index: {}]   ;;  %s2280_s7 = inlined_call_operand.vmem [shape: f32[1,32], index: 7, kind: input, shape index: {}]   ;;  %s2281_s8 = inlined_call_operand.vmem [shape: bf16[32,128], index: 8, kind: input, shape index: {}]   ;;  %s2282_s9 = inlined_call_operand.vmem [shape: f32[1,128], index: 9, kind: input, shape index: {}]   ;;  %s2283_s10 = inlined_call_operand.vmem [shape: bf16[128,32], index: 10, kind: input, shape index: {}]   ;;  %s2284_s11 = inlined_call_operand.vmem [shape: f32[1,32], index: 11, kind: input, shape index: {}]   ;;  %s2285_s12 = inlined_call_operand.hbm [shape: f32[2,8,32], index: 12, kind: output, shape index: {}]  }
   0x1   :  { %v2050_v0 = vld [vmem:[%s2273_s0] sm:$0xff] }
   0x2   :  { %v48_v1 = vsel %vm47_vm0, %v2050_v0, 0.0 }
   0x3   :  { %49 = vadd.xlane.f32.xlu0 %v48_v1 }
   0x4   :  { %17 = vsyncpa [#allocation3], 0  ;;  %v2057_v2 = vld [vmem:[%s2273_s0 + $0x8] sm:$0xff]  ;;  %v1978_v4 = vmov 32.0   ;;  %v1822_v23 = vld [vmem:[%s2276_s3] sm:$0xff]  ;;  %vm727_vm8 = vcmask 64512  }
   0x5   :  { %v51_v3 = vsel %vm47_vm0, %v2057_v2, 0.0  ;;  %1910 = vrcp.f32 %v1978_v4  ;;  %v1823_v21 = vld [vmem:[%s2276_s3 + $0x8] sm:$0xff]  ;;  %v1903_v42 = vld [vmem:[%s2274_s1] ss:$0 sm:$0xff]  ;;  %vm1034_vm10 = vcmask 1043456   ;;  %s1735_s18 = sshll.u32 %s2285_s12, 4  ;;  %s1736_s18 = int_to_ptr.hbm [resolvable:$true] %s1735_s18 }
   0x6   :  { %135 = vmatpush.bf16.msra.mxu0 %v1823_v21  ;;  %v1904_v47 = vld [vmem:[%s2275_s2] ss:$0 sm:$0xff]  ;;  %s1981_s19 = smov 8  }
   0xa   :  { %136 = vmatpush.bf16.msra.mxu0 %v1822_v23 }
   0xb   :  { %52 = vadd.xlane.f32.xlu0 %v51_v3  ;;  %v1911_v5 = vpop.eup %1910 }
   0xc   :  { %v55_v6 = vmul.f32 32.0, %v1911_v5  ;;  %vm59_vm1 = vweird.f32 %v1911_v5 }
   0xe   :  { %v56_v7 = vsub.f32 1.0, %v55_v6 }
  0x10   :  { %v57_v8 = vmul.f32 %v1911_v5, %v56_v7 }
  0x12   :  { %v58_v9 = vadd.f32 %v1911_v5, %v57_v8 }
  0x14   :  { %v2061_v10 = vsel %vm59_vm1, %v1911_v5, %v58_v9 }
  0x76   :  { %v50_v11 = vpop.xlane.xlu0 %49 }
  0x77   :  { %v61_v12 = vmul.f32 %v2061_v10, %v50_v11 }
  0x79   :  { %v63_v13 = vsub.f32 %v2050_v0, %v61_v12 }
  0x7b   :  { %v65_v14 = vmul.f32 %v63_v13, %v63_v13 }
  0x7d   :  { %v67_v15 = vsel %vm47_vm0, %v65_v14, 0.0 }
  0x7e   :  { %68 = vadd.xlane.f32.xlu1 %v67_v15  ;;  %v53_v16 = vpop.xlane.xlu0 %52 }
  0x7f   :  { %v62_v17 = vmul.f32 %v2061_v10, %v53_v16 }
  0x81   :  { %v64_v18 = vsub.f32 %v2057_v2, %v62_v17 }
  0x83   :  { %v66_v19 = vmul.f32 %v64_v18, %v64_v18 }
  0x85   :  { %v70_v20 = vsel %vm47_vm0, %v66_v19, 0.0 }
  0x86   :  { %71 = vadd.xlane.f32.xlu1 %v70_v20 }
  0xf1   :  { %v69_v22 = vpop.xlane.xlu1 %68 }
  0xf2   :  { %v73_v24 = vmul.f32 %v69_v22, %v2061_v10 }
  0xf4   :  { %v75_v25 = vadd.f32 1e-05, %v73_v24 }
  0xf6   :  { %1912 = vrsqrt.f32 %v75_v25  ;;  %vm83_vm3 = vweird.f32 %v75_v25 }
  0xf9   :  { %v72_v26 = vpop.xlane.xlu1 %71 }
  0xfa   :  { %v74_v27 = vmul.f32 %v72_v26, %v2061_v10 }
  0xfc   :  { %v1913_v28 = vpop.eup %1912  ;;  %v76_v29 = vadd.f32 1e-05, %v74_v27 }
  0xfd   :  { %v78_v30 = vmul.f32 %v1913_v28, %v75_v25  ;;  %vm84_vm2 = vweird.f32 %v1913_v28 }
  0xfe   :  { %1914 = vrsqrt.f32 %v76_v29  ;;  %vm85_vm4 = vmor %vm83_vm3, %vm84_vm2  ;;  %vm93_vm6 = vweird.f32 %v76_v29 }
  0xff   :  { %v79_v31 = vmul.f32 %v1913_v28, %v78_v30 }
 0x101   :  { %v80_v32 = vmul.f32 0.5, %v79_v31 }
 0x103   :  { %v81_v33 = vsub.f32 1.5, %v80_v32 }
 0x104   :  { %v1915_v34 = vpop.eup %1914 }
 0x105   :  { %v82_v35 = vmul.f32 %v1913_v28, %v81_v33  ;;  %v88_v36 = vmul.f32 %v1915_v34, %v76_v29  ;;  %vm94_vm5 = vweird.f32 %v1915_v34 }
 0x106   :  { %vm95_vm7 = vmor %vm93_vm6, %vm94_vm5 }
 0x107   :  { %v89_v37 = vmul.f32 %v1915_v34, %v88_v36  ;;  %v86_v38 = vsel %vm85_vm4, %v1913_v28, %v82_v35 }
 0x108   :  { %v97_v41 = vmul.f32 %v86_v38, %v63_v13 }
 0x109   :  { %v90_v39 = vmul.f32 0.5, %v89_v37 }
 0x10a   :  { %v102_v46 = vmul.f32 %v1903_v42, %v97_v41 }
 0x10b   :  { %v91_v40 = vsub.f32 1.5, %v90_v39 }
 0x10c   :  { %v107_v49 = vadd.f32 %v1904_v47, %v102_v46 }
 0x10d   :  { %v92_v43 = vmul.f32 %v1915_v34, %v91_v40 }
 0x10f   :  { %v96_v44 = vsel %vm95_vm7, %v1915_v34, %v92_v43  ;;  %v912_v34 = vlaneseq }
 0x110   :  { %v98_v45 = vmul.f32 %v96_v44, %v64_v18 }
 0x111   :  { %v913_v35 = vshrl.u32 %v912_v34, 7  ;;  %v915_v36 = vand.u32 127, %v912_v34 }
 0x112   :  { %v103_v48 = vmul.f32 %v1903_v42, %v98_v45 }
 0x113   :  { %vm2110_vm9 = vcmp.le.s32.totalorder %v915_v36, %v913_v35 }
 0x114   :  { %v108_v50 = vadd.f32 %v1904_v47, %v103_v48 }
 0x116   :  { %v109_v51 = vpack.c.bf16 %v108_v50, %v107_v49 }
 0x118   :  { %1755 = vmatmul.msk.bf16.vlgmr.msra.gmra.mxu0 %vm47_vm0, %v109_v51 }
 0x195   :  { %v138_v52 = vpop.f32.mrf.mxu0 }
 0x196   :  { %143 = vxpose.xlu2.b32.start.end [1/1] (short) (narrow) %v138_v52, 96 }
 0x19d   :  { %v140_v53 = vpop.f32.mrf.mxu0 }
 0x19e   :  { %175 = vxpose.xlu0.b32.start.end [1/1] (short) (narrow) %v140_v53, 96 }
 0x22f   :  { %v159_v54 = vpop.trf.xlu2 }
 0x230   :  { %207 = vxpose.xlu1.b32.start.end [1/1] (short) (narrow) %v159_v54, 8 }
 0x237   :  { %v160_v55 = vpop.trf.xlu2 }
 0x238   :  { %239 = vxpose.xlu0.b32.start.end [1/1] (short) (narrow) %v160_v55, 8 }
 0x23f   :  { %v161_v56 = vpop.trf.xlu2 }
 0x240   :  { %271 = vxpose.xlu2.b32.start.end [1/1] (short) (narrow) %v161_v56, 8 }
 0x242   :  { %v191_v57 = vpop.trf.xlu0 }
 0x243   :  { %335 = vxpose.xlu1.b32.start.end [1/1] (short) (narrow) %v191_v57, 8 }
 0x247   :  { %v162_v58 = vpop.trf.xlu2 }
 0x24a   :  { %v192_v59 = vpop.trf.xlu0 }
 0x24b   :  { %367 = vxpose.xlu1.b32.start.end [1/1] (short) (narrow) %v192_v59, 8 }
 0x24f   :  { %v163_v60 = vpop.trf.xlu2 }
 0x250   :  { %746 = vmatpush.msra.mxu1 %v163_v60 }
 0x252   :  { %v193_v61 = vpop.trf.xlu0 }
 0x253   :  { %303 = vxpose.xlu1.b32.start.end [1/1] (short) (narrow) %v162_v58, 8  ;;  %399 = vxpose.xlu2.b32.start.end [1/1] (short) (narrow) %v193_v61, 8 }
 0x257   :  { %v164_v62 = vpop.trf.xlu2 }
 0x258   :  { %769 = vmatpush.msra.mxu2 %v164_v62 }
 0x25a   :  { %v194_v63 = vpop.trf.xlu0 }
 0x25b   :  { %431 = vxpose.xlu1.b32.start.end [1/1] (short) (narrow) %v194_v63, 8 }
 0x25f   :  { %v165_v1 = vpop.trf.xlu2 }
 0x260   :  { %792 = vmatpush.msra.mxu3 %v165_v1 }
 0x262   :  { %v195_v3 = vpop.trf.xlu0 }
 0x263   :  { %838 = vmatpush.msrb.mxu2 %v195_v3 }
 0x267   :  { %v166_v4 = vpop.trf.xlu2 }
 0x268   :  { %815 = vmatpush.msrb.mxu1 %v166_v4 }
 0x26a   :  { %v196_v5 = vpop.trf.xlu0 }
 0x26b   :  { %861 = vmatpush.msrb.mxu3 %v196_v5 }
 0x26f   :  { %v2084_v6 = vpop.trf.xlu2 }
 0x272   :  { %v197_v11 = vpop.trf.xlu0 }
 0x277   :  { %v2086_v7 = vpop.trf.xlu2 }
 0x27a   :  { %v198_v12 = vpop.trf.xlu0 }
 0x27f   :  { %v2088_v8 = vpop.trf.xlu2 }
 0x280   :  { %v1841_v9 = vpack.i.bf16 %v2084_v6, %v2088_v8 }
 0x282   :  { %v2092_v13 = vpop.trf.xlu0 }
 0x287   :  { %v2098_v16 = vpop.trf.xlu2 }
 0x288   :  { %v1848_v62 = vpack.i.bf16 %v2098_v16, %v2086_v7 }
 0x28a   :  { %v2094_v14 = vpop.trf.xlu0 }
 0x292   :  { %v2096_v15 = vpop.trf.xlu0 }
 0x29a   :  { %v2100_v17 = vpop.trf.xlu0 }
 0x2d4   :  { %v223_v18 = vpop.trf.xlu1 }
 0x2d5   :  { %v463_v19 = vmul.f32 0.35355338, %v223_v18 }
 0x2d7   :  { %1756 = vmatmul.msk.f32.vlgmr.msra.gmra.mxu1 %vm727_vm8, %v463_v19 }
 0x2d8   :  { %884 = vmatpush.msra.mxu1 %v197_v11 }
 0x2d9   :  { %v287_v20 = vpop.trf.xlu2 }
 0x2da   :  { %v465_v21 = vmul.f32 0.35355338, %v287_v20 }
 0x2dc   :  { %1758 = vmatmul.msk.f32.vlgmr.msra.gmra.mxu3 %vm727_vm8, %v465_v21  ;;  %v255_v22 = vpop.trf.xlu0 }
 0x2dd   :  { %v464_v23 = vmul.f32 0.35355338, %v255_v22 }
 0x2df   :  { %1757 = vmatmul.msk.f32.vlgmr.msra.gmra.mxu2 %vm727_vm8, %v464_v23 }
 0x2e0   :  { %907 = vmatpush.msra.mxu2 %v198_v12 }
 0x2e7   :  { %v351_v24 = vpop.trf.xlu1 }
 0x2e8   :  { %v467_v25 = vmul.f32 0.35355338, %v351_v24 }
 0x2ea   :  { %1760 = vmatmul.msk.f32.vlgmr.msrb.gmra.mxu2 %vm727_vm8, %v467_v25 }
 0x2ec   :  { %v415_v30 = vpop.trf.xlu2 }
 0x2ed   :  { %v469_v31 = vmul.f32 0.35355338, %v415_v30 }
 0x2ef   :  { %v383_v26 = vpop.trf.xlu1 }
 0x2f0   :  { %v468_v27 = vmul.f32 0.35355338, %v383_v26 }
 0x2f2   :  { %1761 = vmatmul.msk.f32.vlgmr.msrb.gmra.mxu3 %vm727_vm8, %v468_v27 }
 0x2f7   :  { %v319_v28 = vpop.trf.xlu1 }
 0x2f8   :  { %v466_v29 = vmul.f32 0.35355338, %v319_v28 }
 0x2fa   :  { %1759 = vmatmul.msk.f32.vlgmr.msrb.gmra.mxu1 %vm727_vm8, %v466_v29 }
 0x2ff   :  { %v447_v32 = vpop.trf.xlu1 }
 0x300   :  { %v470_v33 = vmul.f32 0.35355338, %v447_v32 }
 0x302   :  { %1763 = vmatmul.msk.f32.vlgmr.msra.gmra.mxu2 %vm727_vm8, %v470_v33  ;;  %1762 = vmatmul.msk.f32.vlgmr.msra.gmra.mxu1 %vm727_vm8, %v469_v31 }
 0x354   :  { %v748_v38 = vpop.f32.mrf.mxu1 }
 0x355   :  { %v919_v39 = vsel %vm2110_vm9, %v748_v38, -1e+30 }
 0x356   :  { %v927_v40 = vsel %vm727_vm8, %v919_v39, -inf }
 0x357   :  { %928 = vmax.xlane.f32.xlu2 %v927_v40 }
 0x35f   :  { %v794_v41 = vpop.f32.mrf.mxu3 }
 0x360   :  { %v921_v42 = vsel %vm2110_vm9, %v794_v41, -1e+30 }
 0x361   :  { %v933_v43 = vsel %vm727_vm8, %v921_v42, -inf }
 0x362   :  { %934 = vmax.xlane.f32.xlu1 %v933_v43  ;;  %v771_v44 = vpop.f32.mrf.mxu2 }
 0x363   :  { %v920_v45 = vsel %vm2110_vm9, %v771_v44, -1e+30 }
 0x364   :  { %v930_v46 = vsel %vm727_vm8, %v920_v45, -inf }
 0x365   :  { %931 = vmax.xlane.f32.xlu0 %v930_v46  ;;  %v1855_v46 = vpack.i.bf16 %v2100_v17, %v2094_v14 }
 0x36d   :  { %v840_v47 = vpop.f32.mrf.mxu2 }
 0x36e   :  { %v923_v48 = vsel %vm2110_vm9, %v840_v47, -1e+30 }
 0x36f   :  { %v939_v49 = vsel %vm727_vm8, %v923_v48, -inf }
 0x370   :  { %940 = vmax.xlane.f32.xlu1 %v939_v49 }
 0x375   :  { %v863_v53 = vpop.f32.mrf.mxu3 }
 0x376   :  { %v924_v54 = vsel %vm2110_vm9, %v863_v53, -1e+30 }
 0x377   :  { %v817_v50 = vpop.f32.mrf.mxu1  ;;  %v942_v55 = vsel %vm727_vm8, %v924_v54, -inf }
 0x378   :  { %v922_v51 = vsel %vm2110_vm9, %v817_v50, -1e+30 }
 0x379   :  { %v936_v52 = vsel %vm727_vm8, %v922_v51, -inf }
 0x37a   :  { %937 = vmax.xlane.f32.xlu1 %v936_v52 }
 0x37f   :  { %v886_v56 = vpop.f32.mrf.mxu1 }
 0x380   :  { %v925_v57 = vsel %vm2110_vm9, %v886_v56, -1e+30 }
 0x381   :  { %v945_v61 = vsel %vm727_vm8, %v925_v57, -inf }
 0x382   :  { %943 = vmax.xlane.f32.xlu1 %v942_v55 }
 0x385   :  { %v909_v58 = vpop.f32.mrf.mxu2 }
 0x386   :  { %v926_v59 = vsel %vm2110_vm9, %v909_v58, -1e+30 }
 0x387   :  { %v948_v60 = vsel %vm727_vm8, %v926_v59, -inf }
 0x388   :  { %949 = vmax.xlane.f32.xlu2 %v948_v60 }
 0x38a   :  { %946 = vmax.xlane.f32.xlu1 %v945_v61 }
 0x3b1   :  { %1849 = vxpose.xlu2.b32.start.end [1/1] (short) (narrow) %v1848_v62, 8 }
 0x3c4   :  { %1842 = vxpose.xlu1.b32.start.end [1/1] (short) (narrow) %v1841_v9, 8 }
 0x3ca   :  { %v929_v16 = vpop.xlane.xlu2 %928 }
 0x3cb   :  { %v951_v21 = vsub.f32 %v919_v39, %v929_v16 }
 0x3cd   :  { %v959_v8 = vmul.f32 1.442695, %v951_v21 }
 0x3d5   :  { %v935_v63 = vpop.xlane.xlu1 %934 }
 0x3d6   :  { %v953_v9 = vsub.f32 %v921_v42, %v935_v63 }
 0x3d8   :  { %v932_v7 = vpop.xlane.xlu0 %931  ;;  %v963_v23 = vmul.f32 1.442695, %v953_v9 }
 0x3d9   :  { %v952_v20 = vsub.f32 %v920_v45, %v932_v7 }
 0x3db   :  { %v961_v6 = vmul.f32 1.442695, %v952_v20 }
 0x3e3   :  { %v941_v1 = vpop.xlane.xlu1 %940 }
 0x3e4   :  { %v955_v27 = vsub.f32 %v923_v48, %v941_v1 }
 0x3e6   :  { %v967_v30 = vmul.f32 1.442695, %v955_v27 }
 0x3ed   :  { %v938_v3 = vpop.xlane.xlu1 %937 }
 0x3ee   :  { %v954_v22 = vsub.f32 %v922_v51, %v938_v3 }
 0x3f0   :  { %v965_v25 = vmul.f32 1.442695, %v954_v22 }
 0x3f5   :  { %v944_v4 = vpop.xlane.xlu1 %943 }
 0x3f6   :  { %v956_v33 = vsub.f32 %v924_v54, %v944_v4 }
 0x3f8   :  { %v969_v36 = vmul.f32 1.442695, %v956_v33 }
 0x3fb   :  { %v950_v37 = vpop.xlane.xlu2 %949 }
 0x3fc   :  { %v958_v39 = vsub.f32 %v926_v59, %v950_v37 }
 0x3fd   :  { %v947_v5 = vpop.xlane.xlu1 %946 }
 0x3fe   :  { %v957_v11 = vsub.f32 %v925_v57, %v947_v5  ;;  %v973_v41 = vmul.f32 1.442695, %v958_v39 }
 0x400   :  { %v971_v12 = vmul.f32 1.442695, %v957_v11 }
 0x402   :  { %1916 = vpow2.f32 %v971_v12 }
 0x403   :  { %1918 = vpow2.f32 %v961_v6 }
 0x404   :  { %1920 = vpow2.f32 %v959_v8 }
 0x405   :  { %1922 = vpow2.f32 %v963_v23 }
 0x406   :  { %1924 = vpow2.f32 %v965_v25 }
 0x407   :  { %1926 = vpow2.f32 %v967_v30 }
 0x408   :  { %v2143_v18 = vpop.eup %1916  ;;  %1928 = vpow2.f32 %v969_v36 }
 0x409   :  { %v993_v19 = vsel %vm727_vm8, %v2143_v18, 0.0  ;;  %v1919_v24 = vpop.eup %1918  ;;  %1930 = vpow2.f32 %v973_v41 }
 0x40a   :  { %994 = vadd.xlane.f32.xlu0 %v993_v19  ;;  %v2147_v26 = vpop.eup %1920  ;;  %v978_v28 = vsel %vm727_vm8, %v1919_v24, 0.0 }
 0x40b   :  { %v975_v29 = vsel %vm727_vm8, %v2147_v26, 0.0  ;;  %v1923_v31 = vpop.eup %1922 }
 0x40c   :  { %v2152_v32 = vpop.eup %1924  ;;  %v981_v34 = vsel %vm727_vm8, %v1923_v31, 0.0 }
 0x40d   :  { %v984_v35 = vsel %vm727_vm8, %v2152_v32, 0.0  ;;  %v2157_v38 = vpop.eup %1926 }
 0x40e   :  { %v987_v40 = vsel %vm727_vm8, %v2157_v38, 0.0  ;;  %v2162_v42 = vpop.eup %1928 }
 0x40f   :  { %v990_v43 = vsel %vm727_vm8, %v2162_v42, 0.0  ;;  %v2166_v44 = vpop.eup %1930 }
 0x410   :  { %v996_v45 = vsel %vm727_vm8, %v2166_v44, 0.0 }
 0x422   :  { %979 = vadd.xlane.f32.xlu2 %v978_v28 }
 0x424   :  { %976 = vadd.xlane.f32.xlu1 %v975_v29 }
 0x42a   :  { %982 = vadd.xlane.f32.xlu2 %v981_v34 }
 0x42c   :  { %985 = vadd.xlane.f32.xlu1 %v984_v35 }
 0x432   :  { %988 = vadd.xlane.f32.xlu2 %v987_v40 }
 0x433   :  { %599 = vxpose.xlu0.b32.start.end [1/1] (short) (narrow) %v2092_v13, 8 }
 0x43a   :  { %991 = vadd.xlane.f32.xlu2 %v990_v43 }
 0x442   :  { %997 = vadd.xlane.f32.xlu2 %v996_v45 }
 0x44a   :  { %v1850_v47 = vpop.trf.xlu2 }
 0x44b   :  { %v1851_v49 = vunpack.i.l.bf16 %v1850_v47  ;;  %v1854_v17 = vunpack.i.h.bf16 %v1850_v47 }
 0x44d   :  { %v1024_v50 = vpack.c.bf16 %v1851_v49, %v1851_v49  ;;  %v1026_v56 = vpack.c.bf16 %v1854_v17, %v1854_v17 }
 0x44f   :  { %v1055_v51 = vsel %vm1034_vm10, %v1024_v50, 0 }
 0x450   :  { %1064 = vmatpush.bf16.msrb.mxu0 %v1055_v51 }
 0x466   :  { %1856 = vxpose.xlu1.b32.start.end [1/1] (short) (narrow) %v1855_v46, 8 }
 0x468   :  { %v1843_v13 = vpop.trf.xlu1 }
 0x469   :  { %v1847_v48 = vunpack.i.h.bf16 %v1843_v13  ;;  %v1844_v53 = vunpack.i.l.bf16 %v1843_v13 }
 0x46b   :  { %663 = vxpose.xlu2.b32.start.end [1/1] (short) (narrow) %v2096_v15, 8  ;;  %v1023_v52 = vpack.c.bf16 %v1847_v48, %v1847_v48  ;;  %v1025_v55 = vpack.c.bf16 %v1844_v53, %v1844_v53  ;;  %v1093_v15 = vsel %vm1034_vm10, %v1026_v56, 0 }
 0x46d   :  { %v1036_v54 = vsel %vm1034_vm10, %v1023_v52, 0  ;;  %v1074_v14 = vsel %vm1034_vm10, %v1025_v55, 0 }
 0x46e   :  { %1045 = vmatpush.bf16.msra.mxu3 %v1036_v54  ;;  %1083 = vmatpush.bf16.msrb.mxu2 %v1074_v14 }
 0x472   :  { %1102 = vmatpush.bf16.msra.mxu2 %v1093_v15 }
 0x47d   :  { %v995_v21 = vpop.xlane.xlu0 %994 }
 0x495   :  { %v980_v57 = vpop.xlane.xlu2 %979 }
 0x496   :  { %1932 = vrcp.f32 %v980_v57 }
 0x497   :  { %v977_v58 = vpop.xlane.xlu1 %976 }
 0x498   :  { %1934 = vrcp.f32 %v977_v58 }
 0x49c   :  { %v1933_v59 = vpop.eup %1932 }
 0x49d   :  { %v1008_v60 = vmul.f32 %v1933_v59, %v1919_v24  ;;  %v983_v61 = vpop.xlane.xlu2 %982 }
 0x49e   :  { %v1935_v62 = vpop.eup %1934  ;;  %1936 = vrcp.f32 %v983_v61 }
 0x49f   :  { %v1007_v63 = vmul.f32 %v1935_v62, %v2147_v26  ;;  %v1016_v1 = vpack.c.bf16 %v1008_v60, %v1008_v60  ;;  %v986_v12 = vpop.xlane.xlu1 %985 }
 0x4a0   :  { %1938 = vrcp.f32 %v986_v12 }
 0x4a1   :  { %v1015_v3 = vpack.c.bf16 %v1007_v63, %v1007_v63  ;;  %1765 = vmatmul.msk.bf16.vlgmr.msrb.gmra.mxu0 %vm727_vm8, %v1016_v1  ;;  %v1825_v63 = vld [vmem:[%s2277_s4 + $0x8] sm:$0xff] }
 0x4a3   :  { %1764 = vmatmul.msk.bf16.vlgmr.msra.gmra.mxu3 %vm727_vm8, %v1015_v3 }
 0x4a4   :  { %v1937_v4 = vpop.eup %1936 }
 0x4a5   :  { %v1009_v5 = vmul.f32 %v1937_v4, %v1923_v31  ;;  %v989_v20 = vpop.xlane.xlu2 %988  ;;  %v1824_v4 = vld [vmem:[%s2277_s4] sm:$0xff] }
 0x4a6   :  { %v1939_v19 = vpop.eup %1938  ;;  %1940 = vrcp.f32 %v989_v20 }
 0x4a7   :  { %v1017_v11 = vpack.c.bf16 %v1009_v5, %v1009_v5  ;;  %v1010_v7 = vmul.f32 %v1939_v19, %v2152_v32  ;;  %1942 = vrcp.f32 %v995_v21 }
 0x4a9   :  { %1766 = vmatmul.msk.bf16.vlgmr.msrb.gmra.mxu2 %vm727_vm8, %v1017_v11  ;;  %v1018_v16 = vpack.c.bf16 %v1010_v7, %v1010_v7  ;;  %v1905_v7 = vld [vmem:[%s2278_s5] ss:$0 sm:$0xff] }
 0x4ac   :  { %v1941_v6 = vpop.eup %1940 }
 0x4ad   :  { %v1011_v9 = vmul.f32 %v1941_v6, %v2157_v38  ;;  %v992_v25 = vpop.xlane.xlu2 %991  ;;  %v1943_v27 = vpop.eup %1942 }
 0x4ae   :  { %1944 = vrcp.f32 %v992_v25  ;;  %v1013_v29 = vmul.f32 %v1943_v27, %v2143_v18 }
 0x4af   :  { %v1019_v24 = vpack.c.bf16 %v1011_v9, %v1011_v9 }
 0x4b0   :  { %v1021_v33 = vpack.c.bf16 %v1013_v29, %v1013_v29 }
 0x4b4   :  { %v1945_v32 = vpop.eup %1944 }
 0x4b5   :  { %v998_v26 = vpop.xlane.xlu2 %997  ;;  %v1012_v38 = vmul.f32 %v1945_v32, %v2162_v42  ;;  %v1827_v32 = vld [vmem:[%s2281_s8 + $0x8] sm:$0xff] }
 0x4b6   :  { %1946 = vrcp.f32 %v998_v26 }
 0x4b7   :  { %v1020_v45 = vpack.c.bf16 %v1012_v38, %v1012_v38 }
 0x4b9   :  { %1767 = vmatmul.msk.bf16.vlgmr.msra.gmra.mxu2 %vm727_vm8, %v1018_v16 }
 0x4bc   :  { %v1947_v34 = vpop.eup %1946 }
 0x4bd   :  { %v1014_v39 = vmul.f32 %v1947_v34, %v2166_v44 }
 0x4bf   :  { %v1022_v46 = vpack.c.bf16 %v1014_v39, %v1014_v39 }
 0x4d7   :  { %v615_v8 = vpop.trf.xlu0 }
 0x4d8   :  { %v1027_v22 = vpack.c.bf16 %v615_v8, %v615_v8 }
 0x4da   :  { %v1112_v23 = vsel %vm1034_vm10, %v1027_v22, 0 }
 0x4db   :  { %1121 = vmatpush.bf16.msrb.mxu3 %v1112_v23 }
 0x4de   :  { %1768 = vmatmul.msk.bf16.vlgmr.msrb.gmra.mxu3 %vm727_vm8, %v1019_v24 }
 0x4df   :  { %1530 = vmatpush.bf16.msra.mxu3 %v1825_v63  ;;  %v1829_v63 = vld [vmem:[%s2283_s10 + $0x8] sm:$0xff] }
 0x4e3   :  { %1531 = vmatpush.bf16.msra.mxu3 %v1824_v4  ;;  %v1908_v4 = vld [vmem:[%s2282_s9] ss:$0 sm:$0xff] }
 0x504   :  { %v679_v28 = vpop.trf.xlu2 }
 0x505   :  { %v1029_v30 = vpack.c.bf16 %v679_v28, %v679_v28 }
 0x507   :  { %v1150_v31 = vsel %vm1034_vm10, %v1029_v30, 0 }
 0x508   :  { %1159 = vmatpush.bf16.msrb.mxu1 %v1150_v31 }
 0x50a   :  { %v1857_v35 = vpop.trf.xlu1 }
 0x50b   :  { %v1861_v36 = vunpack.i.h.bf16 %v1857_v35  ;;  %v1858_v37 = vunpack.i.l.bf16 %v1857_v35  ;;  %1770 = vmatmul.msk.bf16.vlgmr.msrb.gmra.mxu1 %vm727_vm8, %v1021_v33 }
 0x50d   :  { %v1028_v40 = vpack.c.bf16 %v1858_v37, %v1858_v37  ;;  %v1030_v41 = vpack.c.bf16 %v1861_v36, %v1861_v36  ;;  %v1826_v36 = vld [vmem:[%s2281_s8] sm:$0xff]  ;;  %v1835_v37 = vld [vmem:[%s2283_s10 + $0x38] sm:$0xff] }
 0x50e   :  { %1711 = vmatpush.bf16.msra.mxu1 %v1835_v37 }
 0x50f   :  { %v1131_v18 = vsel %vm1034_vm10, %v1028_v40, 0  ;;  %v1169_v43 = vsel %vm1034_vm10, %v1030_v41, 0  ;;  %v1834_v40 = vld [vmem:[%s2283_s10 + $0x30] sm:$0xff] }
 0x510   :  { %1140 = vmatpush.bf16.msra.mxu0 %v1131_v18  ;;  %1178 = vmatpush.bf16.msrb.mxu2 %v1169_v43 }
 0x512   :  { %1712 = vmatpush.bf16.msra.mxu1 %v1834_v40 }
 0x513   :  { %1769 = vmatmul.msk.bf16.vlgmr.msra.gmra.mxu0 %vm727_vm8, %v1020_v45  ;;  %1771 = vmatmul.msk.bf16.vlgmr.msrb.gmra.mxu2 %vm727_vm8, %v1022_v46  ;;  %v1833_v45 = vld [vmem:[%s2283_s10 + $0x28] sm:$0xff] }
 0x514   :  { %1632 = vmatpush.bf16.msrb.mxu0 %v1827_v32 }
 0x516   :  { %1713 = vmatpush.bf16.msra.mxu1 %v1833_v45 }
 0x518   :  { %1633 = vmatpush.bf16.msrb.mxu0 %v1826_v36 }
 0x51e   :  { %v1066_v47 = vpop.f32.mrf.mxu0 }
 0x526   :  { %v1047_v13 = vpop.f32.mrf.mxu3  ;;  %v1068_v48 = vpop.f32.mrf.mxu0 }
 0x52c   :  { %v1085_v42 = vpop.f32.mrf.mxu2 }
 0x52e   :  { %v1049_v49 = vpop.f32.mrf.mxu3 }
 0x534   :  { %v1087_v44 = vpop.f32.mrf.mxu2 }
 0x53c   :  { %v1104_v50 = vpop.f32.mrf.mxu2 }
 0x544   :  { %v1106_v51 = vpop.f32.mrf.mxu2 }
 0x561   :  { %v1123_v52 = vpop.f32.mrf.mxu3 }
 0x562   :  { %v1862_v53 = vpack.i.bf16 %v1123_v52, %v1047_v13 }
 0x564   :  { %1863 = vxpose.xlu0.b32.start.end [1/1] (short) (narrow) %v1862_v53, 8  ;;  %v1906_v53 = vld [vmem:[%s2279_s6] ss:$0 sm:$0xff] }
 0x569   :  { %v1125_v54 = vpop.f32.mrf.mxu3 }
 0x588   :  { %v1161_v55 = vpop.f32.mrf.mxu1 }
 0x589   :  { %v1876_v14 = vpack.i.bf16 %v1161_v55, %v1085_v42 }
 0x58b   :  { %1877 = vxpose.xlu2.b32.start.end [1/1] (short) (narrow) %v1876_v14, 8 }
 0x590   :  { %v1142_v17 = vpop.f32.mrf.mxu0  ;;  %v1163_v56 = vpop.f32.mrf.mxu1 }
 0x591   :  { %v1869_v57 = vpack.i.bf16 %v1142_v17, %v1066_v47  ;;  %v1907_v17 = vld [vmem:[%s2280_s7] ss:$0 sm:$0xff] }
 0x593   :  { %1870 = vxpose.xlu1.b32.start.end [1/1] (short) (narrow) %v1869_v57, 8 }
 0x596   :  { %v1180_v15 = vpop.f32.mrf.mxu2 }
 0x597   :  { %v1883_v58 = vpack.i.bf16 %v1180_v15, %v1104_v50 }
 0x598   :  { %v1144_v59 = vpop.f32.mrf.mxu0 }
 0x599   :  { %1884 = vxpose.xlu0.b32.start.end [1/1] (short) (narrow) %v1883_v58, 8 }
 0x59e   :  { %v1182_v60 = vpop.f32.mrf.mxu2 }
 0x608   :  { %v1864_v61 = vpop.trf.xlu0 }
 0x609   :  { %1891 = vxpose.xlu1.b32.start [1/4] (short) (narrow) %v1864_v61, 8  ;;  %v1831_v61 = vld [vmem:[%s2283_s10 + $0x18] sm:$0xff] }
 0x624   :  { %v1878_v62 = vpop.trf.xlu2 }
 0x637   :  { %v1871_v1 = vpop.trf.xlu1 }
 0x638   :  { %1893 = vxpose.xlu1.b32.cont [2/4] (short) (narrow) %v1871_v1, 8  ;;  %v1828_v1 = vld [vmem:[%s2283_s10] sm:$0xff] }
 0x63d   :  { %v1885_v3 = vpop.trf.xlu0 }
 0x640   :  { %1895 = vxpose.xlu1.b32.cont [3/4] (short) (narrow) %v1878_v62, 8  ;;  %v1830_v62 = vld [vmem:[%s2283_s10 + $0x10] sm:$0xff] }
 0x648   :  { %1897 = vxpose.xlu1.b32.end [4/4] (short) (narrow) %v1885_v3, 8 }
 0x6d4   :  { %v1898_v5 = vpop.trf.xlu1 }
 0x6d5   :  { %v1902_v11 = vunpack.i.h.bf16 %v1898_v5  ;;  %v1899_v12 = vunpack.i.l.bf16 %v1898_v5 }
 0x6d7   :  { %v1504_v19 = vpack.c.bf16 %v1902_v11, %v1899_v12 }
 0x6d9   :  { %1780 = vmatmul.msk.bf16.vlgmr.msra.gmra.mxu3 %vm47_vm0, %v1504_v19 }
 0x75c   :  { %v1533_v16 = vpop.f32.mrf.mxu3 }
 0x75d   :  { %v1538_v20 = vadd.f32 %v1533_v16, %v2050_v0 }
 0x75f   :  { %v2206_v21 = vadd.f32 %v1905_v7, %v1538_v20  ;;  %v1909_v20 = vld [vmem:[%s2284_s11] ss:$0 sm:$0xff]  ;;  %s1980_s11 = smov 128  }
 0x761   :  { %v1548_v6 = vsel %vm47_vm0, %v2206_v21, 0.0 }
 0x762   :  { %1549 = vadd.xlane.f32.xlu2 %v1548_v6 }
 0x764   :  { %v1535_v8 = vpop.f32.mrf.mxu3 }
 0x765   :  { %v1539_v9 = vadd.f32 %v1535_v8, %v2057_v2 }
 0x767   :  { %v2211_v22 = vadd.f32 %v1905_v7, %v1539_v9 }
 0x769   :  { %v1551_v23 = vsel %vm47_vm0, %v2211_v22, 0.0 }
 0x76a   :  { %1552 = vadd.xlane.f32.xlu0 %v1551_v23 }
 0x7d5   :  { %v1550_v24 = vpop.xlane.xlu2 %1549 }
 0x7d6   :  { %v1554_v25 = vmul.f32 %v1550_v24, %v2061_v10 }
 0x7d8   :  { %v1556_v0 = vsub.f32 %v2206_v21, %v1554_v25 }
 0x7da   :  { %v1558_v26 = vmul.f32 %v1556_v0, %v1556_v0 }
 0x7dc   :  { %v1560_v27 = vsel %vm47_vm0, %v1558_v26, 0.0 }
 0x7dd   :  { %1561 = vadd.xlane.f32.xlu1 %v1560_v27  ;;  %v1553_v28 = vpop.xlane.xlu0 %1552 }
 0x7de   :  { %v1555_v29 = vmul.f32 %v1553_v28, %v2061_v10 }
 0x7e0   :  { %v1557_v2 = vsub.f32 %v2211_v22, %v1555_v29 }
 0x7e2   :  { %v1559_v30 = vmul.f32 %v1557_v2, %v1557_v2 }
 0x7e4   :  { %v1563_v31 = vsel %vm47_vm0, %v1559_v30, 0.0 }
 0x7e5   :  { %1564 = vadd.xlane.f32.xlu2 %v1563_v31 }
 0x850   :  { %v1562_v33 = vpop.xlane.xlu1 %1561 }
 0x851   :  { %v1566_v34 = vmul.f32 %v1562_v33, %v2061_v10 }
 0x853   :  { %v1568_v35 = vadd.f32 1e-05, %v1566_v34 }
 0x855   :  { %1948 = vrsqrt.f32 %v1568_v35  ;;  %vm1576_vm12 = vweird.f32 %v1568_v35 }
 0x858   :  { %v1565_v38 = vpop.xlane.xlu2 %1564 }
 0x859   :  { %v1567_v39 = vmul.f32 %v1565_v38, %v2061_v10  ;;  %v1832_v10 = vld [vmem:[%s2283_s10 + $0x20] sm:$0xff]  ;;  %s1979_s10 = smov [#allocation2]  }
 0x85a   :  { %1714 = vmatpush.bf16.msra.mxu1 %v1832_v10  ;;  %s1733_s5 = sshll.u32 %s1979_s10, 4  ;;  %s1734_s5 = int_to_ptr.vmem [resolvable:$true] %s1733_s5 }
 0x85b   :  { %v1949_v41 = vpop.eup %1948  ;;  %v1569_v18 = vadd.f32 1e-05, %v1567_v39 }
 0x85c   :  { %v1571_v43 = vmul.f32 %v1949_v41, %v1568_v35  ;;  %vm1577_vm11 = vweird.f32 %v1949_v41 }
 0x85d   :  { %1950 = vrsqrt.f32 %v1569_v18  ;;  %vm1578_vm13 = vmor %vm1576_vm12, %vm1577_vm11  ;;  %vm1586_vm15 = vweird.f32 %v1569_v18 }
 0x85e   :  { %v1572_v46 = vmul.f32 %v1949_v41, %v1571_v43  ;;  %1715 = vmatpush.bf16.msra.mxu1 %v1831_v61 }
 0x860   :  { %v1573_v47 = vmul.f32 0.5, %v1572_v46 }
 0x862   :  { %v1574_v13 = vsub.f32 1.5, %v1573_v47  ;;  %1716 = vmatpush.bf16.msra.mxu1 %v1830_v62 }
 0x863   :  { %v1951_v48 = vpop.eup %1950 }
 0x864   :  { %v1575_v42 = vmul.f32 %v1949_v41, %v1574_v13  ;;  %v1581_v49 = vmul.f32 %v1951_v48, %v1569_v18  ;;  %vm1587_vm14 = vweird.f32 %v1951_v48 }
 0x865   :  { %vm1588_vm1 = vmor %vm1586_vm15, %vm1587_vm14 }
 0x866   :  { %v1582_v44 = vmul.f32 %v1951_v48, %v1581_v49  ;;  %v1579_v50 = vsel %vm1578_vm13, %v1949_v41, %v1575_v42  ;;  %1717 = vmatpush.bf16.msra.mxu1 %v1829_v63 }
 0x867   :  { %v1590_v54 = vmul.f32 %v1579_v50, %v1556_v0 }
 0x868   :  { %v1583_v51 = vmul.f32 0.5, %v1582_v44 }
 0x869   :  { %v1595_v56 = vmul.f32 %v1906_v53, %v1590_v54 }
 0x86a   :  { %v1584_v52 = vsub.f32 1.5, %v1583_v51  ;;  %1718 = vmatpush.bf16.msra.mxu1 %v1828_v1 }
 0x86b   :  { %v1600_v58 = vadd.f32 %v1907_v17, %v1595_v56 }
 0x86c   :  { %v1585_v55 = vmul.f32 %v1951_v48, %v1584_v52 }
 0x86e   :  { %v1589_v14 = vsel %vm1588_vm1, %v1951_v48, %v1585_v55 }
 0x86f   :  { %v1591_v57 = vmul.f32 %v1589_v14, %v1557_v2 }
 0x871   :  { %v1596_v15 = vmul.f32 %v1906_v53, %v1591_v57 }
 0x873   :  { %v1601_v59 = vadd.f32 %v1907_v17, %v1596_v15 }
 0x875   :  { %v1602_v60 = vpack.c.bf16 %v1601_v59, %v1600_v58 }
 0x877   :  { %1789 = vmatmul.msk.bf16.vlgmr.msrb.gmra.mxu0 %vm47_vm0, %v1602_v60 }
 0x8f4   :  { %v1635_v3 = vpop.f32.mrf.mxu0 }
 0x8f5   :  { %v1636_v5 = vadd.f32 %v1908_v4, %v1635_v3 }
 0x8f7   :  { %v1640_v19 = vmax.f32 %v1636_v5, 0.0 }
 0x8fc   :  { %v1637_v11 = vpop.f32.mrf.mxu0 }
 0x8fd   :  { %v1638_v12 = vadd.f32 %v1908_v4, %v1637_v11 }
 0x8ff   :  { %v1641_v7 = vmax.f32 %v1638_v12, 0.0 }
 0x901   :  { %v1642_v16 = vpack.c.bf16 %v1641_v7, %v1640_v19 }
 0x903   :  { %1719 = vmatmul.bf16.vlgmr.msra.gmra.mxu1 %v1642_v16 }
 0x980   :  { %v1720_v6 = vpop.f32.mrf.mxu1 }
 0x981   :  { %v1721_v8 = vadd.f32 %v1909_v20, %v1720_v6 }
 0x983   :  { %v1725_v9 = vadd.f32 %v1721_v8, %v2206_v21 }
 0x985   :  { %1727 = vst.msk [vmem:[#allocation2] sm:$0xff] %vm47_vm0, %v1725_v9 }
 0x988   :  { %v1722_v23 = vpop.f32.mrf.mxu1 }
 0x989   :  { %v1723_v24 = vadd.f32 %v1909_v20, %v1722_v23 }
 0x98b   :  { %v1726_v25 = vadd.f32 %v1723_v24, %v2211_v22 }
 0x98d   :  { %1728 = vst.msk [vmem:[#allocation2 + $0x8] sm:$0xff] %vm47_vm0, %v1726_v25 }
 0x98e   :  { %1741 = dma.vmem_to_hbm [thread:$0]  %s1734_s5, 256, %s1736_s18, [#allocation3], %s1980_s11, %s1980_s11, %s1981_s19  }
 0x98f   :  { %1976 = dma.done.wait [#allocation3], 256  }
 0x990   :  { %1977 = vsyncadd [#allocation3], 4294967040 }
 0x991   :  { %1746 = vsyncpa [#allocation3], 1 }

</bundles_post_ra>
